<compile_context>
chip_gen: v5e
topology: v5e:2x2
jax: 0.10.0
libtpu: 0.0.40
codegen_flags: <defaults>
</compile_context>

<pallas_src>
import math

import jax
import jax.numpy as jnp
from jax.experimental import pallas as pl
from jax.experimental.pallas import tpu as pltpu

# ---------------- config (stand-in for cfg.MODEL.*) ----------------
INPUT_DIM = 16
OUTPUT_DIM = 8
D_MODEL = 32             # cfg.MODEL.LIMB_EMBED_SIZE
NHEAD = 2                # cfg.MODEL.TRANSFORMER.NHEAD
DIM_FEEDFORWARD = 64     # cfg.MODEL.TRANSFORMER.DIM_FEEDFORWARD
NLAYERS = 2              # cfg.MODEL.TRANSFORMER.NLAYERS
DECODER_DIMS = [32]      # cfg.MODEL.TRANSFORMER.DECODER_DIMS
EMBED_INIT = 0.1
DECODER_INIT = 0.01
HEAD_DIM = D_MODEL // NHEAD
LN_EPS = 1e-5
SQRT_D = math.sqrt(D_MODEL)
ATTN_SCALE = 1.0 / math.sqrt(HEAD_DIM)
DEC_HIDDEN = DECODER_DIMS[0]

# ---------------- packed-slab row layout (lane dim always 128) ----------------
SLAB_LANES = 128
# per-layer slab: stride LAYER_ROWS rows per layer; weight lane slices start at 0
QKV_W_R0, OUT_W_R0, FF1_W_R0, FF2_W_R0 = 0, 32, 64, 96
LN1_G_R, LN1_B_R, LN2_G_R, LN2_B_R = 160, 161, 162, 163
QKV_B_R, OUT_B_R, FF1_B_R, FF2_B_R = 164, 165, 166, 167
LAYER_ROWS = 168                      # multiple of 8
# io slab: limb_embed + decoder
EMBED_W_R0, DEC1_W_R0, DEC2_W_R0 = 0, 16, 48
EMBED_B_R, DEC1_B_R, DEC2_B_R = 80, 81, 82
IO_ROWS = 88                          # multiple of 8

_VMEM = pl.BlockSpec(memory_space=pltpu.MemorySpace.VMEM)


# ---------------- in-kernel helpers ----------------
def _layernorm(x, g, b):
    # x: [N, D] f32, g/b: [1, D] f32
    mean = jnp.mean(x, axis=-1, keepdims=True)
    var = jnp.mean(jnp.square(x - mean), axis=-1, keepdims=True)
    return (x - mean) * jax.lax.rsqrt(var + LN_EPS) * g + b


# ---------------- fused forward kernel ----------------
def _dynamics_kernel(x_ref, mask_ref, io_ref, layers_ref, o_ref):
    x = x_ref[...]                 # [N, INPUT_DIM] f32, N = B*S flattened tokens
    mask2d = mask_ref[...]         # [N, N] f32 additive block-diagonal key mask

    # limb_embed + sqrt(d_model) scale
    embed_w = io_ref[EMBED_W_R0:EMBED_W_R0 + INPUT_DIM, 0:D_MODEL]
    embed_b = io_ref[EMBED_B_R:EMBED_B_R + 1, 0:D_MODEL]
    h = (jnp.dot(x, embed_w, preferred_element_type=jnp.float32) + embed_b) * SQRT_D

    # NLAYERS is tiny (2): static Python unroll keeps every slab slice static.
    for l in range(NLAYERS):
        base = l * LAYER_ROWS

        # --- pre-norm self-attention block: h + Attn(LN1(h)) ---
        ln1_g = layers_ref[base + LN1_G_R:base + LN1_G_R + 1, 0:D_MODEL]
        ln1_b = layers_ref[base + LN1_B_R:base + LN1_B_R + 1, 0:D_MODEL]
        h2 = _layernorm(h, ln1_g, ln1_b)

        qkv_w = layers_ref[base + QKV_W_R0:base + QKV_W_R0 + D_MODEL, 0:3 * D_MODEL]
        qkv_b = layers_ref[base + QKV_B_R:base + QKV_B_R + 1, 0:3 * D_MODEL]
        qkv = jnp.dot(h2, qkv_w, preferred_element_type=jnp.float32) + qkv_b  # [N, 3D]

        out_b = layers_ref[base + OUT_B_R:base + OUT_B_R + 1, 0:D_MODEL]
        attn = jnp.zeros(h.shape, jnp.float32)
        for hh in range(NHEAD):
            c = hh * HEAD_DIM
            q = qkv[:, c:c + HEAD_DIM]                                    # [N, Dh]
            k = qkv[:, D_MODEL + c:D_MODEL + c + HEAD_DIM]
            v = qkv[:, 2 * D_MODEL + c:2 * D_MODEL + c + HEAD_DIM]
            s = jnp.dot(q, k.T, preferred_element_type=jnp.float32) * ATTN_SCALE
            s = s + mask2d                                                # shared mask
            s = s - jnp.max(s, axis=-1, keepdims=True)
            p = jnp.exp(s)
            # softmax denom via EUP reciprocal (approx): ~1e-4 rel error, fine for
            # inference; use approx=False for strict torch comparisons.
            p = p * pl.reciprocal(jnp.sum(p, axis=-1, keepdims=True), approx=True)
            o_h = jnp.dot(p, v, preferred_element_type=jnp.float32)       # [N, Dh]
            # fold the head merge into the output projection (no lane concat)
            w_oh = layers_ref[base + OUT_W_R0 + c:base + OUT_W_R0 + c + HEAD_DIM,
                              0:D_MODEL]                                  # [Dh, D]
            attn = attn + jnp.dot(o_h, w_oh, preferred_element_type=jnp.float32)
        h = h + attn + out_b

        # --- pre-norm feedforward block: h + FF(LN2(h)), ReLU FF ---
        ln2_g = layers_ref[base + LN2_G_R:base + LN2_G_R + 1, 0:D_MODEL]
        ln2_b = layers_ref[base + LN2_B_R:base + LN2_B_R + 1, 0:D_MODEL]
        h2 = _layernorm(h, ln2_g, ln2_b)
        ff1_w = layers_ref[base + FF1_W_R0:base + FF1_W_R0 + D_MODEL, 0:DIM_FEEDFORWARD]
        ff1_b = layers_ref[base + FF1_B_R:base + FF1_B_R + 1, 0:DIM_FEEDFORWARD]
        ff = jnp.maximum(
            jnp.dot(h2, ff1_w, preferred_element_type=jnp.float32) + ff1_b, 0.0)
        ff2_w = layers_ref[base + FF2_W_R0:base + FF2_W_R0 + DIM_FEEDFORWARD, 0:D_MODEL]
        ff2_b = layers_ref[base + FF2_B_R:base + FF2_B_R + 1, 0:D_MODEL]
        h = h + jnp.dot(ff, ff2_w, preferred_element_type=jnp.float32) + ff2_b

    # --- decoder MLP: Linear -> ReLU -> Linear (no final nonlinearity) ---
    dec1_w = io_ref[DEC1_W_R0:DEC1_W_R0 + D_MODEL, 0:DEC_HIDDEN]
    dec1_b = io_ref[DEC1_B_R:DEC1_B_R + 1, 0:DEC_HIDDEN]
    d = jnp.maximum(jnp.dot(h, dec1_w, preferred_element_type=jnp.float32) + dec1_b, 0.0)
    dec2_w = io_ref[DEC2_W_R0:DEC2_W_R0 + DEC_HIDDEN, 0:OUTPUT_DIM]
    dec2_b = io_ref[DEC2_B_R:DEC2_B_R + 1, 0:OUTPUT_DIM]
    out = jnp.dot(d, dec2_w, preferred_element_type=jnp.float32) + dec2_b  # [N, OUT]

    # single full-block store (no per-batch masked sub-stores)
    o_ref[...] = out.astype(o_ref.dtype)


# ---------------- wrapper ----------------
def dynamics_forward(params, obs_action_tuple, obs_mask):
    # obs_action_tuple: [B, S, INPUT_DIM] float32
    # obs_mask:         [B, S] bool, True = padded key position
    B, S, _ = obs_action_tuple.shape
    N = B * S
    x = obs_action_tuple.reshape(N, INPUT_DIM)          # batch-major token matrix

    # Block-diagonal additive key mask over flattened tokens: cross-batch keys and
    # padded keys get -1e9 (not -inf: fully padded query rows degrade to uniform
    # attention instead of PyTorch's NaN — documented, fine for valid masks).
    # Built once per call, reused across every layer and head inside the kernel.
    bid = jnp.arange(N, dtype=jnp.int32) // S
    allowed = (bid[:, None] == bid[None, :]) & jnp.logical_not(obs_mask.reshape(1, N))
    mask2d = jnp.where(allowed, 0.0, -1e9).astype(jnp.float32)

    out = pl.pallas_call(
        _dynamics_kernel,
        out_shape=jax.ShapeDtypeStruct((N, OUTPUT_DIM), jnp.float32),
        in_specs=[_VMEM] * 4,
        out_specs=_VMEM,
    )(x, mask2d, params["io_slab"], params["layer_slab"])
    return out.reshape(B, S, OUTPUT_DIM)


# ---------------- parameter init (deterministic, packed slabs) ----------------
def init_params(key):
    keys = iter(jax.random.split(key, 64))

    def u(shape, scale):
        return jax.random.uniform(next(keys), shape, jnp.float32, -scale, scale)

    # io slab: limb_embed + decoder (packing happens once at init, not per call)
    io = jnp.zeros((IO_ROWS, SLAB_LANES), jnp.float32)
    embed_w = u((INPUT_DIM, D_MODEL), EMBED_INIT)                    # EMBED_INIT
    embed_b = u((D_MODEL,), 1.0 / math.sqrt(INPUT_DIM))
    dec1_w = u((D_MODEL, DEC_HIDDEN), 1.0 / math.sqrt(D_MODEL))
    dec1_b = u((DEC_HIDDEN,), 1.0 / math.sqrt(D_MODEL))
    dec2_w = u((DEC_HIDDEN, OUTPUT_DIM), DECODER_INIT)               # DECODER_INIT
    # dec2 bias zeroed per init_weights
    io = io.at[EMBED_W_R0:EMBED_W_R0 + INPUT_DIM, :D_MODEL].set(embed_w)
    io = io.at[DEC1_W_R0:DEC1_W_R0 + D_MODEL, :DEC_HIDDEN].set(dec1_w)
    io = io.at[DEC2_W_R0:DEC2_W_R0 + DEC_HIDDEN, :OUTPUT_DIM].set(dec2_w)
    io = io.at[EMBED_B_R, :D_MODEL].set(embed_b)
    io = io.at[DEC1_B_R, :DEC_HIDDEN].set(dec1_b)

    # per-layer slab
    layers = jnp.zeros((NLAYERS * LAYER_ROWS, SLAB_LANES), jnp.float32)
    for l in range(NLAYERS):
        base = l * LAYER_ROWS
        qkv_w = u((D_MODEL, 3 * D_MODEL), 1.0 / math.sqrt(D_MODEL))
        out_w = u((D_MODEL, D_MODEL), 1.0 / math.sqrt(D_MODEL))
        ff1_w = u((D_MODEL, DIM_FEEDFORWARD), 1.0 / math.sqrt(D_MODEL))
        ff1_b = u((DIM_FEEDFORWARD,), 1.0 / math.sqrt(D_MODEL))
        ff2_w = u((DIM_FEEDFORWARD, D_MODEL), 1.0 / math.sqrt(DIM_FEEDFORWARD))
        ff2_b = u((D_MODEL,), 1.0 / math.sqrt(DIM_FEEDFORWARD))
        layers = layers.at[base + QKV_W_R0:base + QKV_W_R0 + D_MODEL, :3 * D_MODEL].set(qkv_w)
        layers = layers.at[base + OUT_W_R0:base + OUT_W_R0 + D_MODEL, :D_MODEL].set(out_w)
        layers = layers.at[base + FF1_W_R0:base + FF1_W_R0 + D_MODEL, :DIM_FEEDFORWARD].set(ff1_w)
        layers = layers.at[base + FF2_W_R0:base + FF2_W_R0 + DIM_FEEDFORWARD, :D_MODEL].set(ff2_w)
        layers = layers.at[base + LN1_G_R, :D_MODEL].set(1.0)   # LN gamma=1, beta=0
        layers = layers.at[base + LN2_G_R, :D_MODEL].set(1.0)
        # qkv_b / out_b stay zero (MHA default); ff biases below
        layers = layers.at[base + FF1_B_R, :DIM_FEEDFORWARD].set(ff1_b)
        layers = layers.at[base + FF2_B_R, :D_MODEL].set(ff2_b)

    return {"io_slab": io, "layer_slab": layers}


if __name__ == "__main__":
    key = jax.random.PRNGKey(0)
    k_param, k_obs = jax.random.split(key)

    B, S = 2, 8
    params = init_params(k_param)
    obs_action = jax.random.normal(k_obs, (B, S, INPUT_DIM), jnp.float32)
    # mask the last two limbs of the second batch element (True = padded)
    obs_mask = jnp.zeros((B, S), jnp.bool_).at[1, -2:].set(True)

    fwd = jax.jit(dynamics_forward)
    out = fwd(params, obs_action, obs_mask)
    jax.block_until_ready(out)
    assert out.shape == (B, S, OUTPUT_DIM)
    assert bool(jnp.all(jnp.isfinite(out)))
    print("KERNEL_OK")
</pallas_src>

<mosaic_0001>
module attributes {stable_mosaic.version = 11 : i64} {
  func.func @_dynamics_kernel(%arg0: memref<16x16xf32, #tpu.memory_space<vmem>>, %arg1: memref<16x16xf32, #tpu.memory_space<vmem>>, %arg2: memref<88x128xf32, #tpu.memory_space<vmem>>, %arg3: memref<336x128xf32, #tpu.memory_space<vmem>>, %arg4: memref<16x8xf32, #tpu.memory_space<vmem>>) attributes {dimension_semantics = [], scalar_prefetch = 0 : i64, scratch_operands = 0 : i64, tpu.core_type = #tpu.core_type<tc>} {
    %c0 = arith.constant 0 : index
    %c0_0 = arith.constant 0 : index
    %0 = vector.load %arg0[%c0, %c0_0] : memref<16x16xf32, #tpu.memory_space<vmem>>, vector<16x16xf32>
    %c0_1 = arith.constant 0 : index
    %c0_2 = arith.constant 0 : index
    %1 = vector.load %arg1[%c0_1, %c0_2] : memref<16x16xf32, #tpu.memory_space<vmem>>, vector<16x16xf32>
    %c0_3 = arith.constant 0 : index
    %c0_4 = arith.constant 0 : index
    %2 = vector.load %arg2[%c0_3, %c0_4] : memref<88x128xf32, #tpu.memory_space<vmem>>, vector<16x32xf32>
    %c80 = arith.constant 80 : index
    %c0_5 = arith.constant 0 : index
    %3 = vector.load %arg2[%c80, %c0_5] : memref<88x128xf32, #tpu.memory_space<vmem>>, vector<1x32xf32>
    %cst = arith.constant dense<0.000000e+00> : vector<16x32xf32>
    %4 = tpu.matmul %0, %2, %cst {dimension_numbers = #tpu.dot_dimension_numbers<[1], [0], [0], [1], [0, 0, 1, 1], [], []>} : vector<16x16xf32>, vector<16x32xf32>, vector<16x32xf32> -> vector<16x32xf32>
    %5 = vector.broadcast %3 : vector<1x32xf32> to vector<16x32xf32>
    %6 = arith.addf %4, %5 : vector<16x32xf32>
    %cst_6 = arith.constant 5.65685415 : f32
    %7 = vector.broadcast %cst_6 : f32 to vector<16x32xf32>
    %8 = arith.mulf %6, %7 : vector<16x32xf32>
    %c160 = arith.constant 160 : index
    %c0_7 = arith.constant 0 : index
    %9 = vector.load %arg3[%c160, %c0_7] : memref<336x128xf32, #tpu.memory_space<vmem>>, vector<1x32xf32>
    %c161 = arith.constant 161 : index
    %c0_8 = arith.constant 0 : index
    %10 = vector.load %arg3[%c161, %c0_8] : memref<336x128xf32, #tpu.memory_space<vmem>>, vector<1x32xf32>
    %cst_9 = arith.constant dense<0.000000e+00> : vector<16xf32>
    %11 = vector.multi_reduction <add>, %8, %cst_9 [1] : vector<16x32xf32> to vector<16xf32>
    %12 = vector.shape_cast %11 : vector<16xf32> to vector<16x1xf32>
    %cst_10 = arith.constant 3.200000e+01 : f32
    %13 = vector.broadcast %cst_10 : f32 to vector<16x1xf32>
    %14 = arith.divf %12, %13 : vector<16x1xf32>
    %15 = vector.broadcast %14 : vector<16x1xf32> to vector<16x32xf32>
    %16 = arith.subf %8, %15 : vector<16x32xf32>
    %17 = arith.mulf %16, %16 : vector<16x32xf32>
    %cst_11 = arith.constant dense<0.000000e+00> : vector<16xf32>
    %18 = vector.multi_reduction <add>, %17, %cst_11 [1] : vector<16x32xf32> to vector<16xf32>
    %19 = vector.shape_cast %18 : vector<16xf32> to vector<16x1xf32>
    %cst_12 = arith.constant 3.200000e+01 : f32
    %20 = vector.broadcast %cst_12 : f32 to vector<16x1xf32>
    %21 = arith.divf %19, %20 : vector<16x1xf32>
    %22 = vector.broadcast %14 : vector<16x1xf32> to vector<16x32xf32>
    %23 = arith.subf %8, %22 : vector<16x32xf32>
    %cst_13 = arith.constant 9.99999974E-6 : f32
    %24 = vector.broadcast %cst_13 : f32 to vector<16x1xf32>
    %25 = arith.addf %21, %24 : vector<16x1xf32>
    %26 = math.rsqrt %25 : vector<16x1xf32>
    %27 = vector.broadcast %26 : vector<16x1xf32> to vector<16x32xf32>
    %28 = arith.mulf %23, %27 : vector<16x32xf32>
    %29 = vector.broadcast %9 : vector<1x32xf32> to vector<16x32xf32>
    %30 = arith.mulf %28, %29 : vector<16x32xf32>
    %31 = vector.broadcast %10 : vector<1x32xf32> to vector<16x32xf32>
    %32 = arith.addf %30, %31 : vector<16x32xf32>
    %c0_14 = arith.constant 0 : index
    %c0_15 = arith.constant 0 : index
    %33 = vector.load %arg3[%c0_14, %c0_15] : memref<336x128xf32, #tpu.memory_space<vmem>>, vector<32x96xf32>
    %c164 = arith.constant 164 : index
    %c0_16 = arith.constant 0 : index
    %34 = vector.load %arg3[%c164, %c0_16] : memref<336x128xf32, #tpu.memory_space<vmem>>, vector<1x96xf32>
    %cst_17 = arith.constant dense<0.000000e+00> : vector<16x96xf32>
    %35 = tpu.matmul %32, %33, %cst_17 {dimension_numbers = #tpu.dot_dimension_numbers<[1], [0], [0], [1], [0, 0, 1, 1], [], []>} : vector<16x32xf32>, vector<32x96xf32>, vector<16x96xf32> -> vector<16x96xf32>
    %36 = vector.broadcast %34 : vector<1x96xf32> to vector<16x96xf32>
    %37 = arith.addf %35, %36 : vector<16x96xf32>
    %c165 = arith.constant 165 : index
    %c0_18 = arith.constant 0 : index
    %38 = vector.load %arg3[%c165, %c0_18] : memref<336x128xf32, #tpu.memory_space<vmem>>, vector<1x32xf32>
    %cst_19 = arith.constant 0.000000e+00 : f32
    %39 = vector.broadcast %cst_19 : f32 to vector<16x32xf32>
    %40 = vector.extract_strided_slice %37 {offsets = [0, 0], sizes = [16, 16], strides = [1, 1]} : vector<16x96xf32> to vector<16x16xf32>
    %41 = vector.extract_strided_slice %37 {offsets = [0, 32], sizes = [16, 16], strides = [1, 1]} : vector<16x96xf32> to vector<16x16xf32>
    %42 = vector.extract_strided_slice %37 {offsets = [0, 64], sizes = [16, 16], strides = [1, 1]} : vector<16x96xf32> to vector<16x16xf32>
    %43 = tpu.transpose %41, [1, 0] : vector<16x16xf32> -> vector<16x16xf32>
    %cst_20 = arith.constant dense<0.000000e+00> : vector<16x16xf32>
    %44 = tpu.matmul %40, %43, %cst_20 {dimension_numbers = #tpu.dot_dimension_numbers<[1], [0], [0], [1], [0, 0, 1, 1], [], []>} : vector<16x16xf32>, vector<16x16xf32>, vector<16x16xf32> -> vector<16x16xf32>
    %cst_21 = arith.constant 2.500000e-01 : f32
    %45 = vector.broadcast %cst_21 : f32 to vector<16x16xf32>
    %46 = arith.mulf %44, %45 : vector<16x16xf32>
    %47 = arith.addf %46, %1 : vector<16x16xf32>
    %cst_22 = arith.constant dense<0xFF800000> : vector<16xf32>
    %48 = vector.multi_reduction <maximumf>, %47, %cst_22 [1] : vector<16x16xf32> to vector<16xf32>
    %49 = vector.shape_cast %48 : vector<16xf32> to vector<16x1xf32>
    %50 = vector.broadcast %49 : vector<16x1xf32> to vector<16x16xf32>
    %51 = arith.subf %47, %50 : vector<16x16xf32>
    %52 = math.exp %51 : vector<16x16xf32>
    %cst_23 = arith.constant dense<0.000000e+00> : vector<16xf32>
    %53 = vector.multi_reduction <add>, %52, %cst_23 [1] : vector<16x16xf32> to vector<16xf32>
    %54 = vector.shape_cast %53 : vector<16xf32> to vector<16x1xf32>
    %55 = tpu.reciprocal %54 {approx = true} : vector<16x1xf32> -> vector<16x1xf32>
    %56 = vector.broadcast %55 : vector<16x1xf32> to vector<16x16xf32>
    %57 = arith.mulf %52, %56 : vector<16x16xf32>
    %cst_24 = arith.constant dense<0.000000e+00> : vector<16x16xf32>
    %58 = tpu.matmul %57, %42, %cst_24 {dimension_numbers = #tpu.dot_dimension_numbers<[1], [0], [0], [1], [0, 0, 1, 1], [], []>} : vector<16x16xf32>, vector<16x16xf32>, vector<16x16xf32> -> vector<16x16xf32>
    %c32 = arith.constant 32 : index
    %c0_25 = arith.constant 0 : index
    %59 = vector.load %arg3[%c32, %c0_25] : memref<336x128xf32, #tpu.memory_space<vmem>>, vector<16x32xf32>
    %cst_26 = arith.constant dense<0.000000e+00> : vector<16x32xf32>
    %60 = tpu.matmul %58, %59, %cst_26 {dimension_numbers = #tpu.dot_dimension_numbers<[1], [0], [0], [1], [0, 0, 1, 1], [], []>} : vector<16x16xf32>, vector<16x32xf32>, vector<16x32xf32> -> vector<16x32xf32>
    %61 = arith.addf %39, %60 : vector<16x32xf32>
    %62 = vector.extract_strided_slice %37 {offsets = [0, 16], sizes = [16, 16], strides = [1, 1]} : vector<16x96xf32> to vector<16x16xf32>
    %63 = vector.extract_strided_slice %37 {offsets = [0, 48], sizes = [16, 16], strides = [1, 1]} : vector<16x96xf32> to vector<16x16xf32>
    %64 = vector.extract_strided_slice %37 {offsets = [0, 80], sizes = [16, 16], strides = [1, 1]} : vector<16x96xf32> to vector<16x16xf32>
    %65 = tpu.transpose %63, [1, 0] : vector<16x16xf32> -> vector<16x16xf32>
    %cst_27 = arith.constant dense<0.000000e+00> : vector<16x16xf32>
    %66 = tpu.matmul %62, %65, %cst_27 {dimension_numbers = #tpu.dot_dimension_numbers<[1], [0], [0], [1], [0, 0, 1, 1], [], []>} : vector<16x16xf32>, vector<16x16xf32>, vector<16x16xf32> -> vector<16x16xf32>
    %cst_28 = arith.constant 2.500000e-01 : f32
    %67 = vector.broadcast %cst_28 : f32 to vector<16x16xf32>
    %68 = arith.mulf %66, %67 : vector<16x16xf32>
    %69 = arith.addf %68, %1 : vector<16x16xf32>
    %cst_29 = arith.constant dense<0xFF800000> : vector<16xf32>
    %70 = vector.multi_reduction <maximumf>, %69, %cst_29 [1] : vector<16x16xf32> to vector<16xf32>
    %71 = vector.shape_cast %70 : vector<16xf32> to vector<16x1xf32>
    %72 = vector.broadcast %71 : vector<16x1xf32> to vector<16x16xf32>
    %73 = arith.subf %69, %72 : vector<16x16xf32>
    %74 = math.exp %73 : vector<16x16xf32>
    %cst_30 = arith.constant dense<0.000000e+00> : vector<16xf32>
    %75 = vector.multi_reduction <add>, %74, %cst_30 [1] : vector<16x16xf32> to vector<16xf32>
    %76 = vector.shape_cast %75 : vector<16xf32> to vector<16x1xf32>
    %77 = tpu.reciprocal %76 {approx = true} : vector<16x1xf32> -> vector<16x1xf32>
    %78 = vector.broadcast %77 : vector<16x1xf32> to vector<16x16xf32>
    %79 = arith.mulf %74, %78 : vector<16x16xf32>
    %cst_31 = arith.constant dense<0.000000e+00> : vector<16x16xf32>
    %80 = tpu.matmul %79, %64, %cst_31 {dimension_numbers = #tpu.dot_dimension_numbers<[1], [0], [0], [1], [0, 0, 1, 1], [], []>} : vector<16x16xf32>, vector<16x16xf32>, vector<16x16xf32> -> vector<16x16xf32>
    %c48 = arith.constant 48 : index
    %c0_32 = arith.constant 0 : index
    %81 = vector.load %arg3[%c48, %c0_32] : memref<336x128xf32, #tpu.memory_space<vmem>>, vector<16x32xf32>
    %cst_33 = arith.constant dense<0.000000e+00> : vector<16x32xf32>
    %82 = tpu.matmul %80, %81, %cst_33 {dimension_numbers = #tpu.dot_dimension_numbers<[1], [0], [0], [1], [0, 0, 1, 1], [], []>} : vector<16x16xf32>, vector<16x32xf32>, vector<16x32xf32> -> vector<16x32xf32>
    %83 = arith.addf %61, %82 : vector<16x32xf32>
    %84 = arith.addf %8, %83 : vector<16x32xf32>
    %85 = vector.broadcast %38 : vector<1x32xf32> to vector<16x32xf32>
    %86 = arith.addf %84, %85 : vector<16x32xf32>
    %c162 = arith.constant 162 : index
    %c0_34 = arith.constant 0 : index
    %87 = vector.load %arg3[%c162, %c0_34] : memref<336x128xf32, #tpu.memory_space<vmem>>, vector<1x32xf32>
    %c163 = arith.constant 163 : index
    %c0_35 = arith.constant 0 : index
    %88 = vector.load %arg3[%c163, %c0_35] : memref<336x128xf32, #tpu.memory_space<vmem>>, vector<1x32xf32>
    %cst_36 = arith.constant dense<0.000000e+00> : vector<16xf32>
    %89 = vector.multi_reduction <add>, %86, %cst_36 [1] : vector<16x32xf32> to vector<16xf32>
    %90 = vector.shape_cast %89 : vector<16xf32> to vector<16x1xf32>
    %cst_37 = arith.constant 3.200000e+01 : f32
    %91 = vector.broadcast %cst_37 : f32 to vector<16x1xf32>
    %92 = arith.divf %90, %91 : vector<16x1xf32>
    %93 = vector.broadcast %92 : vector<16x1xf32> to vector<16x32xf32>
    %94 = arith.subf %86, %93 : vector<16x32xf32>
    %95 = arith.mulf %94, %94 : vector<16x32xf32>
    %cst_38 = arith.constant dense<0.000000e+00> : vector<16xf32>
    %96 = vector.multi_reduction <add>, %95, %cst_38 [1] : vector<16x32xf32> to vector<16xf32>
    %97 = vector.shape_cast %96 : vector<16xf32> to vector<16x1xf32>
    %cst_39 = arith.constant 3.200000e+01 : f32
    %98 = vector.broadcast %cst_39 : f32 to vector<16x1xf32>
    %99 = arith.divf %97, %98 : vector<16x1xf32>
    %100 = vector.broadcast %92 : vector<16x1xf32> to vector<16x32xf32>
    %101 = arith.subf %86, %100 : vector<16x32xf32>
    %cst_40 = arith.constant 9.99999974E-6 : f32
    %102 = vector.broadcast %cst_40 : f32 to vector<16x1xf32>
    %103 = arith.addf %99, %102 : vector<16x1xf32>
    %104 = math.rsqrt %103 : vector<16x1xf32>
    %105 = vector.broadcast %104 : vector<16x1xf32> to vector<16x32xf32>
    %106 = arith.mulf %101, %105 : vector<16x32xf32>
    %107 = vector.broadcast %87 : vector<1x32xf32> to vector<16x32xf32>
    %108 = arith.mulf %106, %107 : vector<16x32xf32>
    %109 = vector.broadcast %88 : vector<1x32xf32> to vector<16x32xf32>
    %110 = arith.addf %108, %109 : vector<16x32xf32>
    %c64 = arith.constant 64 : index
    %c0_41 = arith.constant 0 : index
    %111 = vector.load %arg3[%c64, %c0_41] : memref<336x128xf32, #tpu.memory_space<vmem>>, vector<32x64xf32>
    %c166 = arith.constant 166 : index
    %c0_42 = arith.constant 0 : index
    %112 = vector.load %arg3[%c166, %c0_42] : memref<336x128xf32, #tpu.memory_space<vmem>>, vector<1x64xf32>
    %cst_43 = arith.constant dense<0.000000e+00> : vector<16x64xf32>
    %113 = tpu.matmul %110, %111, %cst_43 {dimension_numbers = #tpu.dot_dimension_numbers<[1], [0], [0], [1], [0, 0, 1, 1], [], []>} : vector<16x32xf32>, vector<32x64xf32>, vector<16x64xf32> -> vector<16x64xf32>
    %114 = vector.broadcast %112 : vector<1x64xf32> to vector<16x64xf32>
    %115 = arith.addf %113, %114 : vector<16x64xf32>
    %cst_44 = arith.constant 0.000000e+00 : f32
    %116 = vector.broadcast %cst_44 : f32 to vector<16x64xf32>
    %117 = arith.maximumf %115, %116 : vector<16x64xf32>
    %c96 = arith.constant 96 : index
    %c0_45 = arith.constant 0 : index
    %118 = vector.load %arg3[%c96, %c0_45] : memref<336x128xf32, #tpu.memory_space<vmem>>, vector<64x32xf32>
    %c167 = arith.constant 167 : index
    %c0_46 = arith.constant 0 : index
    %119 = vector.load %arg3[%c167, %c0_46] : memref<336x128xf32, #tpu.memory_space<vmem>>, vector<1x32xf32>
    %cst_47 = arith.constant dense<0.000000e+00> : vector<16x32xf32>
    %120 = tpu.matmul %117, %118, %cst_47 {dimension_numbers = #tpu.dot_dimension_numbers<[1], [0], [0], [1], [0, 0, 1, 1], [], []>} : vector<16x64xf32>, vector<64x32xf32>, vector<16x32xf32> -> vector<16x32xf32>
    %121 = arith.addf %86, %120 : vector<16x32xf32>
    %122 = vector.broadcast %119 : vector<1x32xf32> to vector<16x32xf32>
    %123 = arith.addf %121, %122 : vector<16x32xf32>
    %c328 = arith.constant 328 : index
    %c0_48 = arith.constant 0 : index
    %124 = vector.load %arg3[%c328, %c0_48] : memref<336x128xf32, #tpu.memory_space<vmem>>, vector<1x32xf32>
    %c329 = arith.constant 329 : index
    %c0_49 = arith.constant 0 : index
    %125 = vector.load %arg3[%c329, %c0_49] : memref<336x128xf32, #tpu.memory_space<vmem>>, vector<1x32xf32>
    %cst_50 = arith.constant dense<0.000000e+00> : vector<16xf32>
    %126 = vector.multi_reduction <add>, %123, %cst_50 [1] : vector<16x32xf32> to vector<16xf32>
    %127 = vector.shape_cast %126 : vector<16xf32> to vector<16x1xf32>
    %cst_51 = arith.constant 3.200000e+01 : f32
    %128 = vector.broadcast %cst_51 : f32 to vector<16x1xf32>
    %129 = arith.divf %127, %128 : vector<16x1xf32>
    %130 = vector.broadcast %129 : vector<16x1xf32> to vector<16x32xf32>
    %131 = arith.subf %123, %130 : vector<16x32xf32>
    %132 = arith.mulf %131, %131 : vector<16x32xf32>
    %cst_52 = arith.constant dense<0.000000e+00> : vector<16xf32>
    %133 = vector.multi_reduction <add>, %132, %cst_52 [1] : vector<16x32xf32> to vector<16xf32>
    %134 = vector.shape_cast %133 : vector<16xf32> to vector<16x1xf32>
    %cst_53 = arith.constant 3.200000e+01 : f32
    %135 = vector.broadcast %cst_53 : f32 to vector<16x1xf32>
    %136 = arith.divf %134, %135 : vector<16x1xf32>
    %137 = vector.broadcast %129 : vector<16x1xf32> to vector<16x32xf32>
    %138 = arith.subf %123, %137 : vector<16x32xf32>
    %cst_54 = arith.constant 9.99999974E-6 : f32
    %139 = vector.broadcast %cst_54 : f32 to vector<16x1xf32>
    %140 = arith.addf %136, %139 : vector<16x1xf32>
    %141 = math.rsqrt %140 : vector<16x1xf32>
    %142 = vector.broadcast %141 : vector<16x1xf32> to vector<16x32xf32>
    %143 = arith.mulf %138, %142 : vector<16x32xf32>
    %144 = vector.broadcast %124 : vector<1x32xf32> to vector<16x32xf32>
    %145 = arith.mulf %143, %144 : vector<16x32xf32>
    %146 = vector.broadcast %125 : vector<1x32xf32> to vector<16x32xf32>
    %147 = arith.addf %145, %146 : vector<16x32xf32>
    %c168 = arith.constant 168 : index
    %c0_55 = arith.constant 0 : index
    %148 = vector.load %arg3[%c168, %c0_55] : memref<336x128xf32, #tpu.memory_space<vmem>>, vector<32x96xf32>
    %c332 = arith.constant 332 : index
    %c0_56 = arith.constant 0 : index
    %149 = vector.load %arg3[%c332, %c0_56] : memref<336x128xf32, #tpu.memory_space<vmem>>, vector<1x96xf32>
    %cst_57 = arith.constant dense<0.000000e+00> : vector<16x96xf32>
    %150 = tpu.matmul %147, %148, %cst_57 {dimension_numbers = #tpu.dot_dimension_numbers<[1], [0], [0], [1], [0, 0, 1, 1], [], []>} : vector<16x32xf32>, vector<32x96xf32>, vector<16x96xf32> -> vector<16x96xf32>
    %151 = vector.broadcast %149 : vector<1x96xf32> to vector<16x96xf32>
    %152 = arith.addf %150, %151 : vector<16x96xf32>
    %c333 = arith.constant 333 : index
    %c0_58 = arith.constant 0 : index
    %153 = vector.load %arg3[%c333, %c0_58] : memref<336x128xf32, #tpu.memory_space<vmem>>, vector<1x32xf32>
    %cst_59 = arith.constant 0.000000e+00 : f32
    %154 = vector.broadcast %cst_59 : f32 to vector<16x32xf32>
    %155 = vector.extract_strided_slice %152 {offsets = [0, 0], sizes = [16, 16], strides = [1, 1]} : vector<16x96xf32> to vector<16x16xf32>
    %156 = vector.extract_strided_slice %152 {offsets = [0, 32], sizes = [16, 16], strides = [1, 1]} : vector<16x96xf32> to vector<16x16xf32>
    %157 = vector.extract_strided_slice %152 {offsets = [0, 64], sizes = [16, 16], strides = [1, 1]} : vector<16x96xf32> to vector<16x16xf32>
    %158 = tpu.transpose %156, [1, 0] : vector<16x16xf32> -> vector<16x16xf32>
    %cst_60 = arith.constant dense<0.000000e+00> : vector<16x16xf32>
    %159 = tpu.matmul %155, %158, %cst_60 {dimension_numbers = #tpu.dot_dimension_numbers<[1], [0], [0], [1], [0, 0, 1, 1], [], []>} : vector<16x16xf32>, vector<16x16xf32>, vector<16x16xf32> -> vector<16x16xf32>
    %cst_61 = arith.constant 2.500000e-01 : f32
    %160 = vector.broadcast %cst_61 : f32 to vector<16x16xf32>
    %161 = arith.mulf %159, %160 : vector<16x16xf32>
    %162 = arith.addf %161, %1 : vector<16x16xf32>
    %cst_62 = arith.constant dense<0xFF800000> : vector<16xf32>
    %163 = vector.multi_reduction <maximumf>, %162, %cst_62 [1] : vector<16x16xf32> to vector<16xf32>
    %164 = vector.shape_cast %163 : vector<16xf32> to vector<16x1xf32>
    %165 = vector.broadcast %164 : vector<16x1xf32> to vector<16x16xf32>
    %166 = arith.subf %162, %165 : vector<16x16xf32>
    %167 = math.exp %166 : vector<16x16xf32>
    %cst_63 = arith.constant dense<0.000000e+00> : vector<16xf32>
    %168 = vector.multi_reduction <add>, %167, %cst_63 [1] : vector<16x16xf32> to vector<16xf32>
    %169 = vector.shape_cast %168 : vector<16xf32> to vector<16x1xf32>
    %170 = tpu.reciprocal %169 {approx = true} : vector<16x1xf32> -> vector<16x1xf32>
    %171 = vector.broadcast %170 : vector<16x1xf32> to vector<16x16xf32>
    %172 = arith.mulf %167, %171 : vector<16x16xf32>
    %cst_64 = arith.constant dense<0.000000e+00> : vector<16x16xf32>
    %173 = tpu.matmul %172, %157, %cst_64 {dimension_numbers = #tpu.dot_dimension_numbers<[1], [0], [0], [1], [0, 0, 1, 1], [], []>} : vector<16x16xf32>, vector<16x16xf32>, vector<16x16xf32> -> vector<16x16xf32>
    %c200 = arith.constant 200 : index
    %c0_65 = arith.constant 0 : index
    %174 = vector.load %arg3[%c200, %c0_65] : memref<336x128xf32, #tpu.memory_space<vmem>>, vector<16x32xf32>
    %cst_66 = arith.constant dense<0.000000e+00> : vector<16x32xf32>
    %175 = tpu.matmul %173, %174, %cst_66 {dimension_numbers = #tpu.dot_dimension_numbers<[1], [0], [0], [1], [0, 0, 1, 1], [], []>} : vector<16x16xf32>, vector<16x32xf32>, vector<16x32xf32> -> vector<16x32xf32>
    %176 = arith.addf %154, %175 : vector<16x32xf32>
    %177 = vector.extract_strided_slice %152 {offsets = [0, 16], sizes = [16, 16], strides = [1, 1]} : vector<16x96xf32> to vector<16x16xf32>
    %178 = vector.extract_strided_slice %152 {offsets = [0, 48], sizes = [16, 16], strides = [1, 1]} : vector<16x96xf32> to vector<16x16xf32>
    %179 = vector.extract_strided_slice %152 {offsets = [0, 80], sizes = [16, 16], strides = [1, 1]} : vector<16x96xf32> to vector<16x16xf32>
    %180 = tpu.transpose %178, [1, 0] : vector<16x16xf32> -> vector<16x16xf32>
    %cst_67 = arith.constant dense<0.000000e+00> : vector<16x16xf32>
    %181 = tpu.matmul %177, %180, %cst_67 {dimension_numbers = #tpu.dot_dimension_numbers<[1], [0], [0], [1], [0, 0, 1, 1], [], []>} : vector<16x16xf32>, vector<16x16xf32>, vector<16x16xf32> -> vector<16x16xf32>
    %cst_68 = arith.constant 2.500000e-01 : f32
    %182 = vector.broadcast %cst_68 : f32 to vector<16x16xf32>
    %183 = arith.mulf %181, %182 : vector<16x16xf32>
    %184 = arith.addf %183, %1 : vector<16x16xf32>
    %cst_69 = arith.constant dense<0xFF800000> : vector<16xf32>
    %185 = vector.multi_reduction <maximumf>, %184, %cst_69 [1] : vector<16x16xf32> to vector<16xf32>
    %186 = vector.shape_cast %185 : vector<16xf32> to vector<16x1xf32>
    %187 = vector.broadcast %186 : vector<16x1xf32> to vector<16x16xf32>
    %188 = arith.subf %184, %187 : vector<16x16xf32>
    %189 = math.exp %188 : vector<16x16xf32>
    %cst_70 = arith.constant dense<0.000000e+00> : vector<16xf32>
    %190 = vector.multi_reduction <add>, %189, %cst_70 [1] : vector<16x16xf32> to vector<16xf32>
    %191 = vector.shape_cast %190 : vector<16xf32> to vector<16x1xf32>
    %192 = tpu.reciprocal %191 {approx = true} : vector<16x1xf32> -> vector<16x1xf32>
    %193 = vector.broadcast %192 : vector<16x1xf32> to vector<16x16xf32>
    %194 = arith.mulf %189, %193 : vector<16x16xf32>
    %cst_71 = arith.constant dense<0.000000e+00> : vector<16x16xf32>
    %195 = tpu.matmul %194, %179, %cst_71 {dimension_numbers = #tpu.dot_dimension_numbers<[1], [0], [0], [1], [0, 0, 1, 1], [], []>} : vector<16x16xf32>, vector<16x16xf32>, vector<16x16xf32> -> vector<16x16xf32>
    %c216 = arith.constant 216 : index
    %c0_72 = arith.constant 0 : index
    %196 = vector.load %arg3[%c216, %c0_72] : memref<336x128xf32, #tpu.memory_space<vmem>>, vector<16x32xf32>
    %cst_73 = arith.constant dense<0.000000e+00> : vector<16x32xf32>
    %197 = tpu.matmul %195, %196, %cst_73 {dimension_numbers = #tpu.dot_dimension_numbers<[1], [0], [0], [1], [0, 0, 1, 1], [], []>} : vector<16x16xf32>, vector<16x32xf32>, vector<16x32xf32> -> vector<16x32xf32>
    %198 = arith.addf %176, %197 : vector<16x32xf32>
    %199 = arith.addf %123, %198 : vector<16x32xf32>
    %200 = vector.broadcast %153 : vector<1x32xf32> to vector<16x32xf32>
    %201 = arith.addf %199, %200 : vector<16x32xf32>
    %c330 = arith.constant 330 : index
    %c0_74 = arith.constant 0 : index
    %202 = vector.load %arg3[%c330, %c0_74] : memref<336x128xf32, #tpu.memory_space<vmem>>, vector<1x32xf32>
    %c331 = arith.constant 331 : index
    %c0_75 = arith.constant 0 : index
    %203 = vector.load %arg3[%c331, %c0_75] : memref<336x128xf32, #tpu.memory_space<vmem>>, vector<1x32xf32>
    %cst_76 = arith.constant dense<0.000000e+00> : vector<16xf32>
    %204 = vector.multi_reduction <add>, %201, %cst_76 [1] : vector<16x32xf32> to vector<16xf32>
    %205 = vector.shape_cast %204 : vector<16xf32> to vector<16x1xf32>
    %cst_77 = arith.constant 3.200000e+01 : f32
    %206 = vector.broadcast %cst_77 : f32 to vector<16x1xf32>
    %207 = arith.divf %205, %206 : vector<16x1xf32>
    %208 = vector.broadcast %207 : vector<16x1xf32> to vector<16x32xf32>
    %209 = arith.subf %201, %208 : vector<16x32xf32>
    %210 = arith.mulf %209, %209 : vector<16x32xf32>
    %cst_78 = arith.constant dense<0.000000e+00> : vector<16xf32>
    %211 = vector.multi_reduction <add>, %210, %cst_78 [1] : vector<16x32xf32> to vector<16xf32>
    %212 = vector.shape_cast %211 : vector<16xf32> to vector<16x1xf32>
    %cst_79 = arith.constant 3.200000e+01 : f32
    %213 = vector.broadcast %cst_79 : f32 to vector<16x1xf32>
    %214 = arith.divf %212, %213 : vector<16x1xf32>
    %215 = vector.broadcast %207 : vector<16x1xf32> to vector<16x32xf32>
    %216 = arith.subf %201, %215 : vector<16x32xf32>
    %cst_80 = arith.constant 9.99999974E-6 : f32
    %217 = vector.broadcast %cst_80 : f32 to vector<16x1xf32>
    %218 = arith.addf %214, %217 : vector<16x1xf32>
    %219 = math.rsqrt %218 : vector<16x1xf32>
    %220 = vector.broadcast %219 : vector<16x1xf32> to vector<16x32xf32>
    %221 = arith.mulf %216, %220 : vector<16x32xf32>
    %222 = vector.broadcast %202 : vector<1x32xf32> to vector<16x32xf32>
    %223 = arith.mulf %221, %222 : vector<16x32xf32>
    %224 = vector.broadcast %203 : vector<1x32xf32> to vector<16x32xf32>
    %225 = arith.addf %223, %224 : vector<16x32xf32>
    %c232 = arith.constant 232 : index
    %c0_81 = arith.constant 0 : index
    %226 = vector.load %arg3[%c232, %c0_81] : memref<336x128xf32, #tpu.memory_space<vmem>>, vector<32x64xf32>
    %c334 = arith.constant 334 : index
    %c0_82 = arith.constant 0 : index
    %227 = vector.load %arg3[%c334, %c0_82] : memref<336x128xf32, #tpu.memory_space<vmem>>, vector<1x64xf32>
    %cst_83 = arith.constant dense<0.000000e+00> : vector<16x64xf32>
    %228 = tpu.matmul %225, %226, %cst_83 {dimension_numbers = #tpu.dot_dimension_numbers<[1], [0], [0], [1], [0, 0, 1, 1], [], []>} : vector<16x32xf32>, vector<32x64xf32>, vector<16x64xf32> -> vector<16x64xf32>
    %229 = vector.broadcast %227 : vector<1x64xf32> to vector<16x64xf32>
    %230 = arith.addf %228, %229 : vector<16x64xf32>
    %cst_84 = arith.constant 0.000000e+00 : f32
    %231 = vector.broadcast %cst_84 : f32 to vector<16x64xf32>
    %232 = arith.maximumf %230, %231 : vector<16x64xf32>
    %c264 = arith.constant 264 : index
    %c0_85 = arith.constant 0 : index
    %233 = vector.load %arg3[%c264, %c0_85] : memref<336x128xf32, #tpu.memory_space<vmem>>, vector<64x32xf32>
    %c335 = arith.constant 335 : index
    %c0_86 = arith.constant 0 : index
    %234 = vector.load %arg3[%c335, %c0_86] : memref<336x128xf32, #tpu.memory_space<vmem>>, vector<1x32xf32>
    %cst_87 = arith.constant dense<0.000000e+00> : vector<16x32xf32>
    %235 = tpu.matmul %232, %233, %cst_87 {dimension_numbers = #tpu.dot_dimension_numbers<[1], [0], [0], [1], [0, 0, 1, 1], [], []>} : vector<16x64xf32>, vector<64x32xf32>, vector<16x32xf32> -> vector<16x32xf32>
    %236 = arith.addf %201, %235 : vector<16x32xf32>
    %237 = vector.broadcast %234 : vector<1x32xf32> to vector<16x32xf32>
    %238 = arith.addf %236, %237 : vector<16x32xf32>
    %c16 = arith.constant 16 : index
    %c0_88 = arith.constant 0 : index
    %239 = vector.load %arg2[%c16, %c0_88] : memref<88x128xf32, #tpu.memory_space<vmem>>, vector<32x32xf32>
    %c81 = arith.constant 81 : index
    %c0_89 = arith.constant 0 : index
    %240 = vector.load %arg2[%c81, %c0_89] : memref<88x128xf32, #tpu.memory_space<vmem>>, vector<1x32xf32>
    %cst_90 = arith.constant dense<0.000000e+00> : vector<16x32xf32>
    %241 = tpu.matmul %238, %239, %cst_90 {dimension_numbers = #tpu.dot_dimension_numbers<[1], [0], [0], [1], [0, 0, 1, 1], [], []>} : vector<16x32xf32>, vector<32x32xf32>, vector<16x32xf32> -> vector<16x32xf32>
    %242 = vector.broadcast %240 : vector<1x32xf32> to vector<16x32xf32>
    %243 = arith.addf %241, %242 : vector<16x32xf32>
    %cst_91 = arith.constant 0.000000e+00 : f32
    %244 = vector.broadcast %cst_91 : f32 to vector<16x32xf32>
    %245 = arith.maximumf %243, %244 : vector<16x32xf32>
    %c48_92 = arith.constant 48 : index
    %c0_93 = arith.constant 0 : index
    %246 = vector.load %arg2[%c48_92, %c0_93] : memref<88x128xf32, #tpu.memory_space<vmem>>, vector<32x8xf32>
    %c82 = arith.constant 82 : index
    %c0_94 = arith.constant 0 : index
    %247 = vector.load %arg2[%c82, %c0_94] : memref<88x128xf32, #tpu.memory_space<vmem>>, vector<1x8xf32>
    %cst_95 = arith.constant dense<0.000000e+00> : vector<16x8xf32>
    %248 = tpu.matmul %245, %246, %cst_95 {dimension_numbers = #tpu.dot_dimension_numbers<[1], [0], [0], [1], [0, 0, 1, 1], [], []>} : vector<16x32xf32>, vector<32x8xf32>, vector<16x8xf32> -> vector<16x8xf32>
    %249 = vector.broadcast %247 : vector<1x8xf32> to vector<16x8xf32>
    %250 = arith.addf %248, %249 : vector<16x8xf32>
    %c0_96 = arith.constant 0 : index
    %c0_97 = arith.constant 0 : index
    %251 = vector.load %arg4[%c0_96, %c0_97] : memref<16x8xf32, #tpu.memory_space<vmem>>, vector<16x8xf32>
    tpu.vector_store %arg4[%c0_96, %c0_97], %250 {strides = array<i32>} : memref<16x8xf32, #tpu.memory_space<vmem>>, vector<16x8xf32>,
    return
  }
}

</mosaic_0001>

<bundles_post_ra>
// kernel: dynamics_forward.1
= control target key start
LH: loop header
LB: loop body
LE: loop exit
PB: predicated region body
PF: predicated region fallthrough
CT: control target
= control target key end

     0   :  { %9 = vsyncpa [#allocation3], 0  ;;  %s1628_s0 = inlined_call_operand.vmem [shape: f32[16,16], index: 0, kind: input, shape index: {}]   ;;  %s1629_s1 = inlined_call_operand.vmem [shape: f32[16,16], index: 1, kind: input, shape index: {}]   ;;  %s1630_s2 = inlined_call_operand.hbm [shape: f32[88,128], index: 2, kind: input, shape index: {}]   ;;  %s1631_s3 = inlined_call_operand.hbm [shape: f32[336,128], index: 3, kind: input, shape index: {}]   ;;  %s1632_s4 = inlined_call_operand.hbm [shape: f32[16,8], index: 4, kind: output, shape index: {}]  }
   0x1   :  { %10 = vsyncpa [#allocation6], 0 }
   0x2   :  { %11 = vsyncpa [#allocation4], 0  ;;  %s20_s17 = sshll.u32 %s1630_s2, 4  ;;  %s1394_s18 = smov [#allocation2]   ;;  %s21_s17 = int_to_ptr.hbm [resolvable:$true] %s20_s17 }
   0x3   :  { %s22_s19 = sshll.u32 %s1394_s18, 4  ;;  %s33_s22 = sshll.u32 %s1631_s3, 4  ;;  %s23_s19 = int_to_ptr.vmem [resolvable:$true] %s22_s19  ;;  %s34_s22 = int_to_ptr.hbm [resolvable:$true] %s33_s22 }
   0x4   :  { %s1395_s23 = smov 128   ;;  %s1396_s24 = smov 8  }
   0x5   :  { %28 = dma.hbm_to_vmem [thread:$0]  %s21_s17, 1408, %s23_s19, [#allocation3], %s1395_s23, %s1395_s23, %s1396_s24  }
   0x6   :  { %s1397_s25 = smov [#allocation5]  }
   0x7   :  { %s35_s26 = sshll.u32 %s1397_s25, 4  ;;  %s36_s26 = int_to_ptr.vmem [resolvable:$true] %s35_s26 }
   0x8   :  { %41 = dma.hbm_to_vmem [thread:$0]  %s34_s22, 5376, %s36_s26, [#allocation6], %s1395_s23, %s1395_s23, %s1396_s24  }
   0x9   :  { %1388 = dma.done.wait [#allocation3], 1408  }
   0xa   :  { %1389 = vsyncadd [#allocation3], 4294965888 }
   0xb   :  { %1390 = dma.done.wait [#allocation6], 5376  }
   0xc   :  { %1391 = vsyncadd [#allocation6], 4294961920  ;;  %v55_v0 = vld [vmem:[#allocation2 + $0x8] sm:$0xff]  ;;  %v54_v1 = vld [vmem:[#allocation2] sm:$0xff]  ;;  %vm58_vm0 = vcmask 130048   ;;  %vm92_vm1 = vcmask 261120  }
   0xd   :  { %79 = vmatpush.msra.mxu0 %v55_v0  ;;  %1214 = vmatpush.msra.mxu3 %v55_v0  ;;  %v50_v2 = vld [vmem:[%s1628_s0] sm:$0xff]  ;;  %v51_v3 = vld [vmem:[%s1628_s0 + $0x8] sm:$0xff]  ;;  %v1247_v4 = vld [vmem:[#allocation2 + $0x50] ss:$0 sm:$0xff]  ;;  %v1398_v13 = vmov 32.0   ;;  %s1399_s0 = smov 80  }
   0xe   :  { %1266 = vrcp.f32 %v1398_v13  ;;  %v153_v30 = vld [vmem:[#allocation5 + $0x18] sm:$0xff]  ;;  %v152_v31 = vld [vmem:[#allocation5 + $0x10] sm:$0xff]  ;;  %v151_v32 = vld [vmem:[#allocation5 + $0x8] sm:$0xff]  ;;  %s1400_s29 = smov 96   ;;  %s1401_s30 = smov 112   ;;  %vm549_vm15 = vcmask 523264  }
   0xf   :  { %80 = vmatpush.msra.mxu0 %v54_v1  ;;  %1215 = vmatpush.msra.mxu3 %v54_v1  ;;  %v150_v33 = vld [vmem:[#allocation5] sm:$0xff]  ;;  %s1403_s9 = smov 48   ;;  %s1404_s10 = smov [#allocation7]  }
  0x10   :  { %1164 = vmatmul.msk.f32.vlgmr.msra.gmra.mxu0 %vm58_vm0, %v50_v2  ;;  %1165 = vmatmul.msk.f32.vlgmr.msra.gmra.mxu3 %vm58_vm0, %v51_v3  ;;  %v1248_v48 = vld [vmem:[#allocation5 + $0xa0] ss:$0 sm:$0xff]  ;;  %v1249_v52 = vld [vmem:[#allocation5 + $0xa1] ss:$0 sm:$0xff]  ;;  %v1250_v62 = vld [vmem:[#allocation5 + $0xa4] ss:$0 sm:$0xff] }
  0x11   :  { %174 = vmatpush.msra.mxu1 %v153_v30  ;;  %s1148_s11 = sshll.u32 %s1404_s10, 4  ;;  %s1150_s14 = sshll.u32 %s1632_s4, 4  ;;  %s1149_s11 = int_to_ptr.vmem [resolvable:$true] %s1148_s11  ;;  %s1151_s14 = int_to_ptr.hbm [resolvable:$true] %s1150_s14 }
  0x13   :  { %175 = vmatpush.msra.mxu1 %v152_v31 }
  0x14   :  { %v1267_v14 = vpop.eup %1266 }
  0x15   :  { %v100_v15 = vmul.f32 32.0, %v1267_v14  ;;  %vm104_vm2 = vweird.f32 %v1267_v14  ;;  %176 = vmatpush.msra.mxu1 %v151_v32 }
  0x17   :  { %v101_v16 = vsub.f32 1.0, %v100_v15  ;;  %177 = vmatpush.msra.mxu1 %v150_v33 }
  0x19   :  { %v102_v17 = vmul.f32 %v1267_v14, %v101_v16 }
  0x1b   :  { %v103_v18 = vadd.f32 %v1267_v14, %v102_v17  ;;  %v1494_v17 = vld [vmem:[%s1629_s1 + $0x8] sm:$0xff] }
  0x1d   :  { %v1458_v19 = vsel %vm104_vm2, %v1267_v14, %v103_v18 }
  0x8d   :  { %v82_v5 = vpop.f32.mrf.mxu0 }
  0x8e   :  { %v83_v6 = vadd.f32 %v1247_v4, %v82_v5 }
  0x90   :  { %v1450_v7 = vmul.f32 5.656854, %v83_v6 }
  0x92   :  { %v93_v8 = vsel %vm92_vm1, %v1450_v7, 0.0 }
  0x93   :  { %94 = vadd.xlane.f32.xlu0 %v93_v8  ;;  %v85_v9 = vpop.f32.mrf.mxu3 }
  0x94   :  { %v86_v10 = vadd.f32 %v1247_v4, %v85_v9 }
  0x96   :  { %v1454_v11 = vmul.f32 5.656854, %v86_v10 }
  0x98   :  { %v96_v12 = vsel %vm92_vm1, %v1454_v11, 0.0 }
  0x9b   :  { %97 = vadd.xlane.f32.xlu0 %v96_v12  ;;  %v1487_v12 = vld [vmem:[%s1629_s1] sm:$0xff]  ;;  %s1402_s1 = smov 64  }
 0x106   :  { %v95_v20 = vpop.xlane.xlu0 %94 }
 0x107   :  { %v106_v21 = vmul.f32 %v1458_v19, %v95_v20 }
 0x109   :  { %v108_v22 = vsub.f32 %v1450_v7, %v106_v21 }
 0x10b   :  { %v110_v23 = vmul.f32 %v108_v22, %v108_v22 }
 0x10d   :  { %v112_v24 = vsel %vm92_vm1, %v110_v23, 0.0 }
 0x10e   :  { %113 = vadd.xlane.f32.xlu1 %v112_v24  ;;  %v98_v25 = vpop.xlane.xlu0 %97 }
 0x10f   :  { %v107_v26 = vmul.f32 %v1458_v19, %v98_v25 }
 0x111   :  { %v109_v27 = vsub.f32 %v1454_v11, %v107_v26 }
 0x113   :  { %v111_v28 = vmul.f32 %v109_v27, %v109_v27 }
 0x115   :  { %v115_v29 = vsel %vm92_vm1, %v111_v28, 0.0 }
 0x116   :  { %116 = vadd.xlane.f32.xlu1 %v115_v29 }
 0x181   :  { %v114_v34 = vpop.xlane.xlu1 %113 }
 0x182   :  { %v118_v35 = vmul.f32 %v114_v34, %v1458_v19 }
 0x184   :  { %v120_v36 = vadd.f32 1e-05, %v118_v35 }
 0x186   :  { %1268 = vrsqrt.f32 %v120_v36  ;;  %vm128_vm4 = vweird.f32 %v120_v36 }
 0x189   :  { %v117_v37 = vpop.xlane.xlu1 %116 }
 0x18a   :  { %v119_v38 = vmul.f32 %v117_v37, %v1458_v19 }
 0x18c   :  { %v1269_v39 = vpop.eup %1268  ;;  %v121_v40 = vadd.f32 1e-05, %v119_v38 }
 0x18d   :  { %v123_v41 = vmul.f32 %v1269_v39, %v120_v36  ;;  %vm129_vm3 = vweird.f32 %v1269_v39 }
 0x18e   :  { %1270 = vrsqrt.f32 %v121_v40  ;;  %vm130_vm5 = vmor %vm128_vm4, %vm129_vm3  ;;  %vm138_vm7 = vweird.f32 %v121_v40 }
 0x18f   :  { %v124_v42 = vmul.f32 %v1269_v39, %v123_v41 }
 0x191   :  { %v125_v43 = vmul.f32 0.5, %v124_v42 }
 0x193   :  { %v126_v44 = vsub.f32 1.5, %v125_v43 }
 0x194   :  { %v1271_v45 = vpop.eup %1270 }
 0x195   :  { %v127_v46 = vmul.f32 %v1269_v39, %v126_v44  ;;  %v133_v47 = vmul.f32 %v1271_v45, %v121_v40  ;;  %vm139_vm6 = vweird.f32 %v1271_v45 }
 0x196   :  { %vm140_vm8 = vmor %vm138_vm7, %vm139_vm6 }
 0x197   :  { %v131_v49 = vsel %vm130_vm5, %v1269_v39, %v127_v46  ;;  %v134_v50 = vmul.f32 %v1271_v45, %v133_v47 }
 0x198   :  { %v142_v51 = vmul.f32 %v131_v49, %v108_v22 }
 0x199   :  { %v135_v53 = vmul.f32 0.5, %v134_v50 }
 0x19a   :  { %v145_v54 = vmul.f32 %v1248_v48, %v142_v51 }
 0x19b   :  { %v136_v55 = vsub.f32 1.5, %v135_v53 }
 0x19c   :  { %v148_v56 = vadd.f32 %v1249_v52, %v145_v54 }
 0x19d   :  { %v137_v57 = vmul.f32 %v1271_v45, %v136_v55 }
 0x19e   :  { %1166 = vmatmul.msk.f32.vlgmr.msra.gmra.mxu1 %vm92_vm1, %v148_v56 }
 0x19f   :  { %v141_v58 = vsel %vm140_vm8, %v1271_v45, %v137_v57 }
 0x1a0   :  { %v143_v59 = vmul.f32 %v141_v58, %v109_v27  ;;  %v285_v58 = vld [vmem:[#allocation5 + $0x28] sm:$0xff] }
 0x1a2   :  { %v146_v60 = vmul.f32 %v1248_v48, %v143_v59 }
 0x1a4   :  { %v149_v61 = vadd.f32 %v1249_v52, %v146_v60 }
 0x1a6   :  { %1167 = vmatmul.msk.f32.gmra.mxu1 %vm92_vm1, %v149_v61 }
 0x21b   :  { %v179_v63 = vpop.f32.mrf.mxu1 }
 0x21c   :  { %v180_v0 = vadd.f32 %v1250_v62, %v179_v63 }
 0x21e   :  { %290 = vrot.lane.b32.xlu1 %v180_v0, %s1399_s0 }
 0x223   :  { %v182_v1 = vpop.f32.mrf.mxu1 }
 0x224   :  { %v183_v2 = vadd.f32 %v1250_v62, %v182_v1 }
 0x226   :  { %292 = vrot.lane.b32.xlu0 %v183_v2, %s1399_s0  ;;  %190 = vrot.lane.b32.xlu2 %v183_v2, %s1400_s29  ;;  %v1227_v30 = vpack.i.bf16 %v180_v0, %v183_v2 }
 0x22e   :  { %188 = vrot.lane.b32.xlu2 %v180_v0, %s1400_s29 }
 0x236   :  { %286 = vrot.lane.b32.xlu2 %v180_v0, %s1401_s30 }
 0x23e   :  { %288 = vrot.lane.b32.xlu2 %v183_v2, %s1401_s30 }
 0x280   :  { %v191_v3 = vpop.permute.xlu2 %190 }
 0x281   :  { %1168 = vmatpush.xpose.msk.msra.mxu2 %vm58_vm0, %v191_v3 }
 0x288   :  { %v189_v4 = vpop.permute.xlu2 %188 }
 0x289   :  { %1169 = vmatpush.xpose.msk.msra.mxu2 %vm58_vm0, %v189_v4 }
 0x28c   :  { %1170 = vmatmul.msk.f32.vlgmr.msra.gmra.mxu2 %vm58_vm0, %v180_v0 }
 0x28d   :  { %437 = vmatpush.msrb.mxu2 %v285_v58 }
 0x290   :  { %v291_v6 = vpop.permute.xlu1 %290  ;;  %v287_v8 = vpop.permute.xlu2 %286 }
 0x294   :  { %1171 = vmatmul.msk.f32.gmra.mxu2 %vm58_vm0, %v183_v2 }
 0x298   :  { %v293_v5 = vpop.permute.xlu0 %292  ;;  %v289_v9 = vpop.permute.xlu2 %288 }
 0x299   :  { %1174 = vmatpush.xpose.msk.msrb.mxu0 %vm58_vm0, %v293_v5 }
 0x29d   :  { %1175 = vmatpush.xpose.msk.msrb.mxu0 %vm58_vm0, %v291_v6  ;;  %v284_v6 = vld [vmem:[#allocation5 + $0x20] sm:$0xff] }
 0x29e   :  { %438 = vmatpush.msrb.mxu2 %v284_v6 }
 0x2a0   :  { %1176 = vmatmul.msk.f32.vlgmr.msrb.gmra.mxu0 %vm58_vm0, %v287_v8  ;;  %v387_v8 = vld [vmem:[#allocation5 + $0x38] sm:$0xff] }
 0x2a1   :  { %408 = vmatpush.msrb.mxu1 %v387_v8 }
 0x2a8   :  { %1177 = vmatmul.msk.f32.gmra.mxu0 %vm58_vm0, %v289_v9  ;;  %v386_v9 = vld [vmem:[#allocation5 + $0x30] sm:$0xff] }
 0x2a9   :  { %409 = vmatpush.msrb.mxu1 %v386_v9 }
 0x30f   :  { %v217_v10 = vpop.f32.mrf.mxu2 }
 0x310   :  { %v223_v13 = vmul.f32 0.25, %v217_v10 }
 0x312   :  { %v225_v14 = vadd.f32 %v223_v13, %v1487_v12 }
 0x314   :  { %v227_v15 = vsel %vm58_vm0, %v225_v14, -inf }
 0x315   :  { %228 = vmax.xlane.f32.xlu2 %v227_v15 }
 0x317   :  { %v220_v16 = vpop.f32.mrf.mxu2 }
 0x318   :  { %v224_v18 = vmul.f32 0.25, %v220_v16 }
 0x31a   :  { %v226_v20 = vadd.f32 %v224_v18, %v1494_v17 }
 0x31c   :  { %v230_v21 = vsel %vm58_vm0, %v226_v20, -inf }
 0x31d   :  { %231 = vmax.xlane.f32.xlu0 %v230_v21  ;;  %v319_v22 = vpop.f32.mrf.mxu0  ;;  %v1251_v21 = vld [vmem:[#allocation5 + $0xa5] ss:$0 sm:$0xff] }
 0x31e   :  { %v325_v23 = vmul.f32 0.25, %v319_v22 }
 0x320   :  { %v327_v24 = vadd.f32 %v325_v23, %v1487_v12 }
 0x322   :  { %v329_v25 = vsel %vm58_vm0, %v327_v24, -inf }
 0x323   :  { %330 = vmax.xlane.f32.xlu1 %v329_v25 }
 0x325   :  { %v322_v26 = vpop.f32.mrf.mxu0 }
 0x326   :  { %v326_v27 = vmul.f32 0.25, %v322_v26 }
 0x328   :  { %v328_v28 = vadd.f32 %v326_v27, %v1494_v17 }
 0x32a   :  { %v332_v29 = vsel %vm58_vm0, %v328_v28, -inf }
 0x32b   :  { %333 = vmax.xlane.f32.xlu2 %v332_v29 }
 0x343   :  { %1228 = vrot.lane.b32.xlu2 %v1227_v30, %s1402_s1 }
 0x388   :  { %v229_v31 = vpop.xlane.xlu2 %228 }
 0x389   :  { %v233_v32 = vsub.f32 %v225_v14, %v229_v31 }
 0x38b   :  { %v235_v33 = vmul.f32 1.442695, %v233_v32 }
 0x38d   :  { %1272 = vpow2.f32 %v235_v33 }
 0x390   :  { %v232_v34 = vpop.xlane.xlu0 %231 }
 0x391   :  { %v234_v35 = vsub.f32 %v226_v20, %v232_v34 }
 0x393   :  { %v1273_v36 = vpop.eup %1272  ;;  %v237_v37 = vmul.f32 1.442695, %v234_v35 }
 0x394   :  { %v239_v38 = vsel %vm58_vm0, %v1273_v36, 0.0 }
 0x395   :  { %1274 = vpow2.f32 %v237_v37  ;;  %240 = vadd.xlane.f32.xlu0 %v239_v38 }
 0x396   :  { %v331_v39 = vpop.xlane.xlu1 %330 }
 0x397   :  { %v335_v40 = vsub.f32 %v327_v24, %v331_v39  ;;  %v506_v39 = vld [vmem:[#allocation5 + $0x58] sm:$0xff] }
 0x398   :  { %527 = vmatpush.msra.mxu0 %v506_v39 }
 0x399   :  { %v337_v41 = vmul.f32 1.442695, %v335_v40  ;;  %v505_v40 = vld [vmem:[#allocation5 + $0x50] sm:$0xff] }
 0x39a   :  { %528 = vmatpush.msra.mxu0 %v505_v40 }
 0x39b   :  { %v1275_v42 = vpop.eup %1274  ;;  %1276 = vpow2.f32 %v337_v41  ;;  %v504_v41 = vld [vmem:[#allocation5 + $0x48] sm:$0xff] }
 0x39c   :  { %v242_v43 = vsel %vm58_vm0, %v1275_v42, 0.0  ;;  %529 = vmatpush.msra.mxu0 %v504_v41 }
 0x39d   :  { %243 = vadd.xlane.f32.xlu1 %v242_v43 }
 0x39e   :  { %v334_v44 = vpop.xlane.xlu2 %333 }
 0x39f   :  { %v336_v45 = vsub.f32 %v328_v28, %v334_v44 }
 0x3a1   :  { %v1277_v46 = vpop.eup %1276  ;;  %v339_v47 = vmul.f32 1.442695, %v336_v45 }
 0x3a2   :  { %v341_v48 = vsel %vm58_vm0, %v1277_v46, 0.0 }
 0x3a3   :  { %1278 = vpow2.f32 %v339_v47  ;;  %342 = vadd.xlane.f32.xlu0 %v341_v48  ;;  %v546_v47 = vld [vmem:[#allocation5 + $0x90] sm:$0xff]  ;;  %v545_v48 = vld [vmem:[#allocation5 + $0x88] sm:$0xff] }
 0x3a6   :  { %v1229_v49 = vpop.permute.xlu2 %1228 }
 0x3a7   :  { %v1230_v50 = vunpack.i.l.bf16 %v1229_v49  ;;  %v1231_v52 = vunpack.i.h.bf16 %v1229_v49 }
 0x3a9   :  { %v1279_v51 = vpop.eup %1278  ;;  %275 = vmatpush.msrb.mxu3 %v1230_v50 }
 0x3aa   :  { %v344_v53 = vsel %vm58_vm0, %v1279_v51, 0.0 }
 0x3ab   :  { %345 = vadd.xlane.f32.xlu0 %v344_v53  ;;  %276 = vmatpush.msrb.mxu3 %v1231_v52 }
 0x3b6   :  { %1233 = vrot.lane.b32.xlu1 %v1227_v30, %s1403_s9 }
 0x408   :  { %v241_v54 = vpop.xlane.xlu0 %240 }
 0x409   :  { %1280 = vrcp.f32 %v241_v54  ;;  %v543_v54 = vld [vmem:[#allocation5 + $0x78] sm:$0xff] }
 0x40f   :  { %v1281_v55 = vpop.eup %1280 }
 0x410   :  { %v244_v56 = vpop.xlane.xlu1 %243  ;;  %v247_v57 = vmul.f32 %v1281_v55, %v1273_v36 }
 0x411   :  { %1282 = vrcp.f32 %v244_v56 }
 0x412   :  { %1172 = vmatmul.msk.f32.vlgmr.msrb.gmra.mxu3 %vm58_vm0, %v247_v57 }
 0x416   :  { %v343_v61 = vpop.xlane.xlu0 %342 }
 0x417   :  { %v1283_v59 = vpop.eup %1282  ;;  %1284 = vrcp.f32 %v343_v61 }
 0x418   :  { %v248_v60 = vmul.f32 %v1283_v59, %v1275_v42  ;;  %v503_v42 = vld [vmem:[#allocation5 + $0x40] sm:$0xff] }
 0x419   :  { %530 = vmatpush.msra.mxu0 %v503_v42 }
 0x41a   :  { %1173 = vmatmul.msk.f32.gmra.mxu3 %vm58_vm0, %v248_v60 }
 0x41d   :  { %v1285_v0 = vpop.eup %1284 }
 0x41e   :  { %v346_v62 = vpop.xlane.xlu0 %345  ;;  %v349_v3 = vmul.f32 %v1285_v0, %v1277_v46  ;;  %v547_v46 = vld [vmem:[#allocation5 + $0x98] sm:$0xff] }
 0x41f   :  { %1286 = vrcp.f32 %v346_v62  ;;  %v1252_v62 = vld [vmem:[#allocation5 + $0xa2] ss:$0 sm:$0xff] }
 0x425   :  { %v1287_v4 = vpop.eup %1286 }
 0x426   :  { %v350_v5 = vmul.f32 %v1287_v4, %v1279_v51  ;;  %v544_v51 = vld [vmem:[#allocation5 + $0x80] sm:$0xff] }
 0x428   :  { %v1234_v63 = vpop.permute.xlu1 %1233 }
 0x429   :  { %v1235_v1 = vunpack.i.l.bf16 %v1234_v63  ;;  %v1236_v2 = vunpack.i.h.bf16 %v1234_v63 }
 0x42b   :  { %377 = vmatpush.msra.mxu3 %v1235_v1 }
 0x42d   :  { %378 = vmatpush.msra.mxu3 %v1236_v2  ;;  %v1253_v2 = vld [vmem:[#allocation5 + $0xa3] ss:$0 sm:$0xff] }
 0x42e   :  { %1178 = vmatmul.msk.f32.vlgmr.msra.gmra.mxu3 %vm58_vm0, %v349_v3 }
 0x42f   :  { %564 = vmatpush.msrb.mxu3 %v547_v46  ;;  %v637_v46 = vld [vmem:[#allocation5 + $0xb0] sm:$0xff] }
 0x431   :  { %565 = vmatpush.msrb.mxu3 %v546_v47  ;;  %v636_v47 = vld [vmem:[#allocation5 + $0xa8] sm:$0xff] }
 0x433   :  { %566 = vmatpush.msrb.mxu3 %v545_v48 }
 0x435   :  { %567 = vmatpush.msrb.mxu3 %v544_v51 }
 0x436   :  { %1179 = vmatmul.msk.f32.gmra.mxu3 %vm58_vm0, %v350_v5 }
 0x437   :  { %568 = vmatpush.msrb.mxu3 %v543_v54 }
 0x495   :  { %v278_v10 = vpop.f32.mrf.mxu3 }
 0x496   :  { %1182 = vmatmul.msk.f32.vlgmr.msrb.gmra.mxu2 %vm58_vm0, %v278_v10 }
 0x49d   :  { %v281_v13 = vpop.f32.mrf.mxu3 }
 0x49e   :  { %1183 = vmatmul.msk.f32.gmra.mxu2 %vm58_vm0, %v281_v13 }
 0x4b1   :  { %v380_v14 = vpop.f32.mrf.mxu3 }
 0x4b2   :  { %1180 = vmatmul.msk.f32.vlgmr.msrb.gmra.mxu1 %vm58_vm0, %v380_v14 }
 0x4b9   :  { %v383_v15 = vpop.f32.mrf.mxu3 }
 0x4ba   :  { %1181 = vmatmul.msk.f32.gmra.mxu1 %vm58_vm0, %v383_v15  ;;  %v542_v15 = vld [vmem:[#allocation5 + $0x70] sm:$0xff] }
 0x4bb   :  { %569 = vmatpush.msrb.mxu3 %v542_v15  ;;  %v1258_v15 = vld [vmem:[#allocation5 + $0x14c] ss:$0 sm:$0xff] }
 0x519   :  { %v440_v16 = vpop.f32.mrf.mxu2 }
 0x521   :  { %v443_v25 = vpop.f32.mrf.mxu2 }
 0x52f   :  { %v411_v18 = vpop.f32.mrf.mxu1 }
 0x530   :  { %v441_v20 = vadd.f32 %v440_v16, %v411_v18  ;;  %v541_v16 = vld [vmem:[#allocation5 + $0x68] sm:$0xff]  ;;  %v540_v18 = vld [vmem:[#allocation5 + $0x60] sm:$0xff] }
 0x531   :  { %570 = vmatpush.msrb.mxu3 %v541_v16 }
 0x532   :  { %v446_v22 = vadd.f32 %v441_v20, %v1450_v7  ;;  %v1254_v20 = vld [vmem:[#allocation5 + $0xa6] ss:$0 sm:$0xff] }
 0x533   :  { %571 = vmatpush.msrb.mxu3 %v540_v18 }
 0x534   :  { %v1517_v23 = vadd.f32 %v1251_v21, %v446_v22 }
 0x536   :  { %v453_v24 = vsel %vm92_vm1, %v1517_v23, 0.0 }
 0x537   :  { %454 = vadd.xlane.f32.xlu0 %v453_v24  ;;  %v414_v26 = vpop.f32.mrf.mxu1 }
 0x538   :  { %v444_v27 = vadd.f32 %v443_v25, %v414_v26 }
 0x53a   :  { %v447_v28 = vadd.f32 %v444_v27, %v1454_v11 }
 0x53c   :  { %v1522_v29 = vadd.f32 %v1251_v21, %v447_v28  ;;  %v1255_v28 = vld [vmem:[#allocation5 + $0xa7] ss:$0 sm:$0xff] }
 0x53e   :  { %v456_v30 = vsel %vm92_vm1, %v1522_v29, 0.0 }
 0x53f   :  { %457 = vadd.xlane.f32.xlu2 %v456_v30 }
 0x5aa   :  { %v455_v31 = vpop.xlane.xlu0 %454 }
 0x5ab   :  { %v459_v7 = vmul.f32 %v455_v31, %v1458_v19 }
 0x5ad   :  { %v461_v32 = vsub.f32 %v1517_v23, %v459_v7 }
 0x5af   :  { %v463_v33 = vmul.f32 %v461_v32, %v461_v32 }
 0x5b1   :  { %v465_v34 = vsel %vm92_vm1, %v463_v33, 0.0 }
 0x5b2   :  { %466 = vadd.xlane.f32.xlu0 %v465_v34  ;;  %v458_v35 = vpop.xlane.xlu2 %457 }
 0x5b3   :  { %v460_v36 = vmul.f32 %v458_v35, %v1458_v19 }
 0x5b5   :  { %v462_v11 = vsub.f32 %v1522_v29, %v460_v36 }
 0x5b7   :  { %v464_v37 = vmul.f32 %v462_v11, %v462_v11 }
 0x5b9   :  { %v468_v38 = vsel %vm92_vm1, %v464_v37, 0.0 }
 0x5ba   :  { %469 = vadd.xlane.f32.xlu1 %v468_v38 }
 0x625   :  { %v467_v43 = vpop.xlane.xlu0 %466 }
 0x626   :  { %v471_v44 = vmul.f32 %v467_v43, %v1458_v19 }
 0x628   :  { %v473_v45 = vadd.f32 1e-05, %v471_v44  ;;  %v639_v44 = vld [vmem:[#allocation5 + $0xc0] sm:$0xff] }
 0x629   :  { %660 = vmatpush.msra.mxu1 %v639_v44 }
 0x62a   :  { %1288 = vrsqrt.f32 %v473_v45  ;;  %vm481_vm10 = vweird.f32 %v473_v45 }
 0x62d   :  { %v470_v49 = vpop.xlane.xlu1 %469 }
 0x62e   :  { %v472_v50 = vmul.f32 %v470_v49, %v1458_v19 }
 0x630   :  { %v1289_v52 = vpop.eup %1288  ;;  %v474_v53 = vadd.f32 1e-05, %v472_v50 }
 0x631   :  { %v476_v55 = vmul.f32 %v1289_v52, %v473_v45  ;;  %vm482_vm9 = vweird.f32 %v1289_v52  ;;  %v638_v45 = vld [vmem:[#allocation5 + $0xb8] sm:$0xff] }
 0x632   :  { %1290 = vrsqrt.f32 %v474_v53  ;;  %vm483_vm11 = vmor %vm481_vm10, %vm482_vm9  ;;  %vm491_vm13 = vweird.f32 %v474_v53  ;;  %661 = vmatpush.msra.mxu1 %v638_v45 }
 0x633   :  { %v477_v56 = vmul.f32 %v1289_v52, %v476_v55 }
 0x634   :  { %662 = vmatpush.msra.mxu1 %v637_v46 }
 0x635   :  { %v478_v57 = vmul.f32 0.5, %v477_v56 }
 0x636   :  { %663 = vmatpush.msra.mxu1 %v636_v47 }
 0x637   :  { %v479_v58 = vsub.f32 1.5, %v478_v57 }
 0x638   :  { %v1291_v59 = vpop.eup %1290 }
 0x639   :  { %v480_v60 = vmul.f32 %v1289_v52, %v479_v58  ;;  %v486_v61 = vmul.f32 %v1291_v59, %v474_v53  ;;  %vm492_vm12 = vweird.f32 %v1291_v59 }
 0x63a   :  { %vm493_vm14 = vmor %vm491_vm13, %vm492_vm12  ;;  %vm1141_vm13 = vcmask 64512  }
 0x63b   :  { %v484_v63 = vsel %vm483_vm11, %v1289_v52, %v480_v60  ;;  %v487_v0 = vmul.f32 %v1291_v59, %v486_v61 }
 0x63c   :  { %v495_v1 = vmul.f32 %v484_v63, %v461_v32 }
 0x63d   :  { %v488_v3 = vmul.f32 0.5, %v487_v0 }
 0x63e   :  { %v498_v4 = vmul.f32 %v1252_v62, %v495_v1 }
 0x63f   :  { %v489_v5 = vsub.f32 1.5, %v488_v3 }
 0x640   :  { %v501_v6 = vadd.f32 %v1253_v2, %v498_v4 }
 0x641   :  { %v490_v8 = vmul.f32 %v1291_v59, %v489_v5 }
 0x642   :  { %1184 = vmatmul.msk.f32.vlgmr.msra.gmra.mxu0 %vm92_vm1, %v501_v6 }
 0x643   :  { %v494_v9 = vsel %vm493_vm14, %v1291_v59, %v490_v8 }
 0x644   :  { %v496_v10 = vmul.f32 %v494_v9, %v462_v11 }
 0x646   :  { %v499_v13 = vmul.f32 %v1252_v62, %v496_v10  ;;  %v1256_v62 = vld [vmem:[#allocation5 + $0x148] ss:$0 sm:$0xff] }
 0x648   :  { %v502_v14 = vadd.f32 %v1253_v2, %v499_v13  ;;  %v1257_v2 = vld [vmem:[#allocation5 + $0x149] ss:$0 sm:$0xff] }
 0x64a   :  { %1185 = vmatmul.msk.f32.gmra.mxu0 %vm92_vm1, %v502_v14 }
 0x6bf   :  { %v532_v21 = vpop.f32.mrf.mxu0 }
 0x6c0   :  { %v533_v22 = vadd.f32 %v1254_v20, %v532_v21 }
 0x6c2   :  { %v538_v24 = vmax.f32 %v533_v22, 0.0 }
 0x6c4   :  { %1186 = vmatmul.msk.f32.vlgmr.msrb.gmra.mxu3 %vm549_vm15, %v538_v24 }
 0x6c7   :  { %v535_v25 = vpop.f32.mrf.mxu0 }
 0x6c8   :  { %v536_v26 = vadd.f32 %v1254_v20, %v535_v25 }
 0x6ca   :  { %v539_v27 = vmax.f32 %v536_v26, 0.0 }
 0x6cc   :  { %1187 = vmatmul.msk.f32.gmra.mxu3 %vm549_vm15, %v539_v27 }
 0x747   :  { %v573_v30 = vpop.f32.mrf.mxu3 }
 0x748   :  { %v579_v31 = vadd.f32 %v573_v30, %v1517_v23 }
 0x74a   :  { %v1539_v7 = vadd.f32 %v1255_v28, %v579_v31 }
 0x74c   :  { %v586_v32 = vsel %vm92_vm1, %v1539_v7, 0.0 }
 0x74d   :  { %587 = vadd.xlane.f32.xlu0 %v586_v32 }
 0x74f   :  { %v576_v33 = vpop.f32.mrf.mxu3 }
 0x750   :  { %v580_v34 = vadd.f32 %v576_v33, %v1522_v29 }
 0x752   :  { %v1544_v35 = vadd.f32 %v1255_v28, %v580_v34 }
 0x754   :  { %v589_v36 = vsel %vm92_vm1, %v1544_v35, 0.0 }
 0x755   :  { %590 = vadd.xlane.f32.xlu0 %v589_v36 }
 0x7c0   :  { %v588_v11 = vpop.xlane.xlu0 %587 }
 0x7c1   :  { %v592_v37 = vmul.f32 %v588_v11, %v1458_v19 }
 0x7c3   :  { %v594_v23 = vsub.f32 %v1539_v7, %v592_v37 }
 0x7c5   :  { %v596_v38 = vmul.f32 %v594_v23, %v594_v23 }
 0x7c7   :  { %v598_v39 = vsel %vm92_vm1, %v596_v38, 0.0 }
 0x7c8   :  { %599 = vadd.xlane.f32.xlu0 %v598_v39  ;;  %v591_v40 = vpop.xlane.xlu0 %590 }
 0x7c9   :  { %v593_v41 = vmul.f32 %v591_v40, %v1458_v19 }
 0x7cb   :  { %v595_v29 = vsub.f32 %v1544_v35, %v593_v41 }
 0x7cd   :  { %v597_v42 = vmul.f32 %v595_v29, %v595_v29 }
 0x7cf   :  { %v601_v43 = vsel %vm92_vm1, %v597_v42, 0.0 }
 0x7d0   :  { %602 = vadd.xlane.f32.xlu0 %v601_v43 }
 0x83b   :  { %v600_v48 = vpop.xlane.xlu0 %599 }
 0x83c   :  { %v604_v49 = vmul.f32 %v600_v48, %v1458_v19 }
 0x83e   :  { %v606_v50 = vadd.f32 1e-05, %v604_v49 }
 0x840   :  { %1292 = vrsqrt.f32 %v606_v50  ;;  %vm614_vm3 = vweird.f32 %v606_v50 }
 0x843   :  { %v603_v51 = vpop.xlane.xlu0 %602 }
 0x844   :  { %v605_v52 = vmul.f32 %v603_v51, %v1458_v19 }
 0x846   :  { %v1293_v53 = vpop.eup %1292  ;;  %v607_v54 = vadd.f32 1e-05, %v605_v52 }
 0x847   :  { %v609_v55 = vmul.f32 %v1293_v53, %v606_v50  ;;  %vm615_vm2 = vweird.f32 %v1293_v53 }
 0x848   :  { %1294 = vrsqrt.f32 %v607_v54  ;;  %vm616_vm4 = vmor %vm614_vm3, %vm615_vm2  ;;  %vm624_vm6 = vweird.f32 %v607_v54 }
 0x849   :  { %v610_v56 = vmul.f32 %v1293_v53, %v609_v55 }
 0x84b   :  { %v611_v57 = vmul.f32 0.5, %v610_v56 }
 0x84d   :  { %v612_v58 = vsub.f32 1.5, %v611_v57 }
 0x84e   :  { %v1295_v59 = vpop.eup %1294 }
 0x84f   :  { %v613_v60 = vmul.f32 %v1293_v53, %v612_v58  ;;  %v619_v61 = vmul.f32 %v1295_v59, %v607_v54  ;;  %vm625_vm5 = vweird.f32 %v1295_v59 }
 0x850   :  { %vm626_vm7 = vmor %vm624_vm6, %vm625_vm5 }
 0x851   :  { %v617_v63 = vsel %vm616_vm4, %v1293_v53, %v613_v60  ;;  %v620_v0 = vmul.f32 %v1295_v59, %v619_v61 }
 0x852   :  { %v628_v1 = vmul.f32 %v617_v63, %v594_v23 }
 0x853   :  { %v621_v3 = vmul.f32 0.5, %v620_v0 }
 0x854   :  { %v631_v4 = vmul.f32 %v1256_v62, %v628_v1 }
 0x855   :  { %v622_v5 = vsub.f32 1.5, %v621_v3 }
 0x856   :  { %v634_v6 = vadd.f32 %v1257_v2, %v631_v4 }
 0x857   :  { %v623_v8 = vmul.f32 %v1295_v59, %v622_v5 }
 0x858   :  { %1188 = vmatmul.msk.f32.vlgmr.msra.gmra.mxu1 %vm92_vm1, %v634_v6 }
 0x859   :  { %v627_v9 = vsel %vm626_vm7, %v1295_v59, %v623_v8 }
 0x85a   :  { %v629_v10 = vmul.f32 %v627_v9, %v595_v29 }
 0x85c   :  { %v632_v13 = vmul.f32 %v1256_v62, %v629_v10 }
 0x85e   :  { %v635_v14 = vadd.f32 %v1257_v2, %v632_v13  ;;  %v873_v2 = vld [vmem:[#allocation5 + $0xe0] sm:$0xff] }
 0x860   :  { %1189 = vmatmul.msk.f32.gmra.mxu1 %vm92_vm1, %v635_v14 }
 0x8d5   :  { %v665_v16 = vpop.f32.mrf.mxu1 }
 0x8d6   :  { %v666_v18 = vadd.f32 %v1258_v15, %v665_v16 }
 0x8d8   :  { %776 = vrot.lane.b32.xlu0 %v666_v18, %s1399_s0 }
 0x8dd   :  { %v668_v20 = vpop.f32.mrf.mxu1 }
 0x8de   :  { %v669_v21 = vadd.f32 %v1258_v15, %v668_v20 }
 0x8e0   :  { %772 = vrot.lane.b32.xlu0 %v666_v18, %s1401_s30  ;;  %676 = vrot.lane.b32.xlu1 %v669_v21, %s1400_s29  ;;  %v1237_v44 = vpack.i.bf16 %v666_v18, %v669_v21 }
 0x8e1   :  { %778 = vrot.lane.b32.xlu2 %v669_v21, %s1399_s0 }
 0x8e8   :  { %774 = vrot.lane.b32.xlu0 %v669_v21, %s1401_s30 }
 0x8e9   :  { %674 = vrot.lane.b32.xlu2 %v666_v18, %s1400_s29 }
 0x93b   :  { %v779_v22 = vpop.permute.xlu2 %778 }
 0x93c   :  { %1196 = vmatpush.xpose.msk.msra.mxu3 %vm58_vm0, %v779_v22 }
 0x943   :  { %v675_v27 = vpop.permute.xlu2 %674 }
 0x94a   :  { %v777_v24 = vpop.permute.xlu0 %776 }
 0x94b   :  { %1197 = vmatpush.xpose.msk.msra.mxu3 %vm58_vm0, %v777_v24  ;;  %v872_v24 = vld [vmem:[#allocation5 + $0xd8] sm:$0xff] }
 0x952   :  { %v677_v25 = vpop.permute.xlu1 %676  ;;  %v773_v26 = vpop.permute.xlu0 %772 }
 0x953   :  { %1190 = vmatpush.xpose.msk.msra.mxu2 %vm58_vm0, %v677_v25  ;;  %1198 = vmatmul.msk.f32.vlgmr.msra.gmra.mxu3 %vm58_vm0, %v773_v26  ;;  %v771_v25 = vld [vmem:[#allocation5 + $0xd0] sm:$0xff]  ;;  %v770_v26 = vld [vmem:[#allocation5 + $0xc8] sm:$0xff] }
 0x957   :  { %1191 = vmatpush.xpose.msk.msra.mxu2 %vm58_vm0, %v675_v27 }
 0x95a   :  { %1192 = vmatmul.msk.f32.vlgmr.msra.gmra.mxu2 %vm58_vm0, %v666_v18  ;;  %v775_v28 = vpop.permute.xlu0 %774 }
 0x95b   :  { %1199 = vmatmul.msk.f32.gmra.mxu3 %vm58_vm0, %v775_v28  ;;  %894 = vmatpush.msrb.mxu2 %v873_v2 }
 0x95d   :  { %895 = vmatpush.msrb.mxu2 %v872_v24 }
 0x962   :  { %1193 = vmatmul.msk.f32.gmra.mxu2 %vm58_vm0, %v669_v21 }
 0x9d6   :  { %v805_v30 = vpop.f32.mrf.mxu3 }
 0x9d7   :  { %v811_v31 = vmul.f32 0.25, %v805_v30 }
 0x9d9   :  { %v813_v32 = vadd.f32 %v811_v31, %v1487_v12 }
 0x9db   :  { %v815_v33 = vsel %vm58_vm0, %v813_v32, -inf }
 0x9dc   :  { %816 = vmax.xlane.f32.xlu2 %v815_v33 }
 0x9dd   :  { %v703_v34 = vpop.f32.mrf.mxu2 }
 0x9de   :  { %v709_v36 = vmul.f32 0.25, %v703_v34  ;;  %v808_v11 = vpop.f32.mrf.mxu3 }
 0x9df   :  { %v812_v37 = vmul.f32 0.25, %v808_v11 }
 0x9e0   :  { %v711_v23 = vadd.f32 %v709_v36, %v1487_v12  ;;  %v1259_v36 = vld [vmem:[#allocation5 + $0x14d] ss:$0 sm:$0xff] }
 0x9e1   :  { %v814_v38 = vadd.f32 %v812_v37, %v1494_v17 }
 0x9e2   :  { %v713_v39 = vsel %vm58_vm0, %v711_v23, -inf }
 0x9e3   :  { %714 = vmax.xlane.f32.xlu1 %v713_v39  ;;  %v818_v40 = vsel %vm58_vm0, %v814_v38, -inf }
 0x9e4   :  { %819 = vmax.xlane.f32.xlu0 %v818_v40 }
 0x9e5   :  { %v706_v41 = vpop.f32.mrf.mxu2 }
 0x9e6   :  { %v710_v29 = vmul.f32 0.25, %v706_v41 }
 0x9e8   :  { %v712_v42 = vadd.f32 %v710_v29, %v1494_v17 }
 0x9ea   :  { %v716_v43 = vsel %vm58_vm0, %v712_v42, -inf }
 0x9eb   :  { %717 = vmax.xlane.f32.xlu2 %v716_v43 }
 0x9f8   :  { %1238 = vrot.lane.b32.xlu0 %v1237_v44, %s1403_s9 }
 0xa4f   :  { %v817_v45 = vpop.xlane.xlu2 %816 }
 0xa50   :  { %v821_v12 = vsub.f32 %v813_v32, %v817_v45 }
 0xa52   :  { %v823_v46 = vmul.f32 1.442695, %v821_v12 }
 0xa54   :  { %1296 = vpow2.f32 %v823_v46 }
 0xa56   :  { %v715_v47 = vpop.xlane.xlu1 %714 }
 0xa57   :  { %v719_v48 = vsub.f32 %v711_v23, %v715_v47  ;;  %v820_v49 = vpop.xlane.xlu0 %819 }
 0xa58   :  { %v822_v50 = vsub.f32 %v814_v38, %v820_v49 }
 0xa59   :  { %v721_v51 = vmul.f32 1.442695, %v719_v48 }
 0xa5a   :  { %v1297_v52 = vpop.eup %1296  ;;  %v825_v53 = vmul.f32 1.442695, %v822_v50  ;;  %v992_v50 = vld [vmem:[#allocation5 + $0x100] sm:$0xff] }
 0xa5b   :  { %1298 = vpow2.f32 %v721_v51  ;;  %v827_v17 = vsel %vm58_vm0, %v1297_v52, 0.0  ;;  %1013 = vmatpush.msrb.mxu3 %v992_v50  ;;  %v991_v51 = vld [vmem:[#allocation5 + $0xf8] sm:$0xff] }
 0xa5c   :  { %1300 = vpow2.f32 %v825_v53  ;;  %828 = vadd.xlane.f32.xlu1 %v827_v17  ;;  %v989_v53 = vld [vmem:[#allocation5 + $0xe8] sm:$0xff]  ;;  %v1264_v50 = vld [vmem:[#allocation2 + $0x51] ss:$0 sm:$0xff] }
 0xa5d   :  { %1014 = vmatpush.msrb.mxu3 %v991_v51 }
 0xa5e   :  { %v718_v54 = vpop.xlane.xlu2 %717 }
 0xa5f   :  { %v720_v55 = vsub.f32 %v712_v42, %v718_v54 }
 0xa61   :  { %v1299_v56 = vpop.eup %1298  ;;  %v723_v57 = vmul.f32 1.442695, %v720_v55 }
 0xa62   :  { %v1301_v58 = vpop.eup %1300  ;;  %v725_v59 = vsel %vm58_vm0, %v1299_v56, 0.0 }
 0xa63   :  { %1302 = vpow2.f32 %v723_v57  ;;  %726 = vadd.xlane.f32.xlu2 %v725_v59  ;;  %v830_v60 = vsel %vm58_vm0, %v1301_v58, 0.0  ;;  %v1032_v57 = vld [vmem:[#allocation5 + $0x138] sm:$0xff] }
 0xa64   :  { %831 = vadd.xlane.f32.xlu1 %v830_v60 }
 0xa69   :  { %v1303_v61 = vpop.eup %1302 }
 0xa6a   :  { %v1239_v62 = vpop.permute.xlu0 %1238  ;;  %v728_v63 = vsel %vm58_vm0, %v1303_v61, 0.0 }
 0xa6b   :  { %v1240_v0 = vunpack.i.l.bf16 %v1239_v62  ;;  %v1241_v1 = vunpack.i.h.bf16 %v1239_v62 }
 0xa6c   :  { %729 = vadd.xlane.f32.xlu1 %v728_v63 }
 0xa6d   :  { %863 = vmatpush.msrb.mxu1 %v1240_v0  ;;  %v1029_v0 = vld [vmem:[#allocation5 + $0x120] sm:$0xff] }
 0xa6f   :  { %864 = vmatpush.msrb.mxu1 %v1241_v1 }
 0xa7b   :  { %1243 = vrot.lane.b32.xlu2 %v1237_v44, %s1402_s1 }
 0xacf   :  { %v829_v3 = vpop.xlane.xlu1 %828 }
 0xad0   :  { %1304 = vrcp.f32 %v829_v3 }
 0xad6   :  { %v1305_v4 = vpop.eup %1304  ;;  %v727_v5 = vpop.xlane.xlu2 %726 }
 0xad7   :  { %v835_v6 = vmul.f32 %v1305_v4, %v1297_v52  ;;  %v832_v8 = vpop.xlane.xlu1 %831  ;;  %v990_v52 = vld [vmem:[#allocation5 + $0xf0] sm:$0xff] }
 0xad8   :  { %1306 = vrcp.f32 %v832_v8  ;;  %1015 = vmatpush.msrb.mxu3 %v990_v52 }
 0xad9   :  { %1308 = vrcp.f32 %v727_v5  ;;  %1200 = vmatmul.msk.f32.vlgmr.msrb.gmra.mxu1 %vm58_vm0, %v835_v6 }
 0xada   :  { %1016 = vmatpush.msrb.mxu3 %v989_v53 }
 0xade   :  { %v1307_v9 = vpop.eup %1306  ;;  %v1244_v10 = vpop.permute.xlu2 %1243 }
 0xadf   :  { %v1309_v13 = vpop.eup %1308  ;;  %v1245_v14 = vunpack.i.l.bf16 %v1244_v10  ;;  %v730_v15 = vpop.xlane.xlu1 %729  ;;  %v836_v16 = vmul.f32 %v1307_v9, %v1301_v58  ;;  %v1246_v18 = vunpack.i.h.bf16 %v1244_v10  ;;  %v1031_v58 = vld [vmem:[#allocation5 + $0x130] sm:$0xff]  ;;  %v1260_v9 = vld [vmem:[#allocation5 + $0x14a] ss:$0 sm:$0xff] }
 0xae0   :  { %1310 = vrcp.f32 %v730_v15  ;;  %v733_v20 = vmul.f32 %v1309_v13, %v1299_v56  ;;  %v1033_v56 = vld [vmem:[#allocation5 + $0x140] sm:$0xff] }
 0xae1   :  { %761 = vmatpush.msrb.mxu0 %v1245_v14  ;;  %1201 = vmatmul.msk.f32.gmra.mxu1 %vm58_vm0, %v836_v16  ;;  %v1261_v14 = vld [vmem:[#allocation5 + $0x14b] ss:$0 sm:$0xff] }
 0xae2   :  { %1049 = vmatpush.msra.mxu1 %v1033_v56 }
 0xae3   :  { %762 = vmatpush.msrb.mxu0 %v1246_v18 }
 0xae4   :  { %1194 = vmatmul.msk.f32.vlgmr.msrb.gmra.mxu0 %vm58_vm0, %v733_v20  ;;  %1050 = vmatpush.msra.mxu1 %v1032_v57 }
 0xae5   :  { %923 = vmatpush.msra.mxu0 %v771_v25 }
 0xae6   :  { %v1311_v21 = vpop.eup %1310  ;;  %1051 = vmatpush.msra.mxu1 %v1031_v58 }
 0xae7   :  { %v734_v22 = vmul.f32 %v1311_v21, %v1303_v61  ;;  %924 = vmatpush.msra.mxu0 %v770_v26  ;;  %v1030_v61 = vld [vmem:[#allocation5 + $0x128] sm:$0xff] }
 0xae8   :  { %1052 = vmatpush.msra.mxu1 %v1030_v61 }
 0xaea   :  { %1053 = vmatpush.msra.mxu1 %v1029_v0 }
 0xaec   :  { %1195 = vmatmul.msk.f32.gmra.mxu0 %vm58_vm0, %v734_v22 }
 0xb56   :  { %v866_v27 = vpop.f32.mrf.mxu1 }
 0xb57   :  { %1202 = vmatmul.msk.f32.vlgmr.msrb.gmra.mxu2 %vm58_vm0, %v866_v27  ;;  %v1028_v27 = vld [vmem:[#allocation5 + $0x118] sm:$0xff] }
 0xb58   :  { %1054 = vmatpush.msra.mxu1 %v1028_v27 }
 0xb5e   :  { %v869_v28 = vpop.f32.mrf.mxu1 }
 0xb5f   :  { %1203 = vmatmul.msk.f32.gmra.mxu2 %vm58_vm0, %v869_v28  ;;  %v1027_v28 = vld [vmem:[#allocation5 + $0x110] sm:$0xff] }
 0xb60   :  { %1055 = vmatpush.msra.mxu1 %v1027_v28 }
 0xb61   :  { %v764_v30 = vpop.f32.mrf.mxu0 }
 0xb62   :  { %1204 = vmatmul.msk.f32.vlgmr.msra.gmra.mxu0 %vm58_vm0, %v764_v30  ;;  %v1026_v30 = vld [vmem:[#allocation5 + $0x108] sm:$0xff] }
 0xb63   :  { %1056 = vmatpush.msra.mxu1 %v1026_v30 }
 0xb69   :  { %v767_v31 = vpop.f32.mrf.mxu0 }
 0xb6a   :  { %1205 = vmatmul.msk.f32.gmra.mxu0 %vm58_vm0, %v767_v31  ;;  %v1072_v31 = vld [vmem:[#allocation2 + $0x28] sm:$0xff] }
 0xb6b   :  { %1093 = vmatpush.msra.mxu2 %v1072_v31 }
 0xbda   :  { %v897_v32 = vpop.f32.mrf.mxu2 }
 0xbdf   :  { %v926_v33 = vpop.f32.mrf.mxu0 }
 0xbe0   :  { %v927_v34 = vadd.f32 %v926_v33, %v897_v32  ;;  %v1262_v32 = vld [vmem:[#allocation5 + $0x14e] ss:$0 sm:$0xff] }
 0xbe2   :  { %v932_v11 = vadd.f32 %v927_v34, %v1539_v7  ;;  %v900_v38 = vpop.f32.mrf.mxu2 }
 0xbe4   :  { %v1595_v37 = vadd.f32 %v1259_v36, %v932_v11 }
 0xbe6   :  { %v939_v23 = vsel %vm92_vm1, %v1595_v37, 0.0 }
 0xbe7   :  { %v929_v39 = vpop.f32.mrf.mxu0  ;;  %940 = vadd.xlane.f32.xlu0 %v939_v23 }
 0xbe8   :  { %v930_v40 = vadd.f32 %v929_v39, %v900_v38  ;;  %v1071_v39 = vld [vmem:[#allocation2 + $0x20] sm:$0xff] }
 0xbe9   :  { %1094 = vmatpush.msra.mxu2 %v1071_v39 }
 0xbea   :  { %v933_v41 = vadd.f32 %v930_v40, %v1544_v35  ;;  %v1070_v40 = vld [vmem:[#allocation2 + $0x18] sm:$0xff] }
 0xbeb   :  { %1095 = vmatpush.msra.mxu2 %v1070_v40 }
 0xbec   :  { %v1600_v29 = vadd.f32 %v1259_v36, %v933_v41  ;;  %v1069_v41 = vld [vmem:[#allocation2 + $0x10] sm:$0xff] }
 0xbed   :  { %1096 = vmatpush.msra.mxu2 %v1069_v41 }
 0xbee   :  { %v942_v42 = vsel %vm92_vm1, %v1600_v29, 0.0 }
 0xbef   :  { %943 = vadd.xlane.f32.xlu1 %v942_v42  ;;  %v1109_v42 = vld [vmem:[#allocation2 + $0x48] sm:$0xff] }
 0xbf0   :  { %1130 = vmatpush.msrb.mxu0 %v1109_v42 }
 0xc5a   :  { %v941_v43 = vpop.xlane.xlu0 %940 }
 0xc5b   :  { %v945_v7 = vmul.f32 %v941_v43, %v1458_v19  ;;  %v1263_v43 = vld [vmem:[#allocation5 + $0x14f] ss:$0 sm:$0xff] }
 0xc5d   :  { %v947_v44 = vsub.f32 %v1595_v37, %v945_v7 }
 0xc5f   :  { %v949_v45 = vmul.f32 %v947_v44, %v947_v44 }
 0xc61   :  { %v951_v12 = vsel %vm92_vm1, %v949_v45, 0.0 }
 0xc62   :  { %952 = vadd.xlane.f32.xlu1 %v951_v12  ;;  %v944_v46 = vpop.xlane.xlu1 %943 }
 0xc63   :  { %v946_v47 = vmul.f32 %v944_v46, %v1458_v19 }
 0xc65   :  { %v948_v35 = vsub.f32 %v1600_v29, %v946_v47 }
 0xc67   :  { %v950_v48 = vmul.f32 %v948_v35, %v948_v35 }
 0xc69   :  { %v954_v49 = vsel %vm92_vm1, %v950_v48, 0.0  ;;  %v1107_v48 = vld [vmem:[#allocation2 + $0x38] sm:$0xff] }
 0xc6a   :  { %955 = vadd.xlane.f32.xlu2 %v954_v49  ;;  %v1106_v49 = vld [vmem:[#allocation2 + $0x30] sm:$0xff] }
 0xcd5   :  { %v953_v17 = vpop.xlane.xlu1 %952 }
 0xcd6   :  { %v957_v54 = vmul.f32 %v953_v17, %v1458_v19 }
 0xcd8   :  { %v959_v55 = vadd.f32 1e-05, %v957_v54 }
 0xcda   :  { %1312 = vrsqrt.f32 %v959_v55  ;;  %vm967_vm8 = vweird.f32 %v959_v55 }
 0xcdd   :  { %v956_v59 = vpop.xlane.xlu2 %955 }
 0xcde   :  { %v958_v60 = vmul.f32 %v956_v59, %v1458_v19 }
 0xce0   :  { %v1313_v62 = vpop.eup %1312  ;;  %v960_v63 = vadd.f32 1e-05, %v958_v60 }
 0xce1   :  { %v962_v1 = vmul.f32 %v1313_v62, %v959_v55  ;;  %vm968_vm0 = vweird.f32 %v1313_v62 }
 0xce2   :  { %1314 = vrsqrt.f32 %v960_v63  ;;  %vm969_vm9 = vmor %vm967_vm8, %vm968_vm0  ;;  %vm977_vm11 = vweird.f32 %v960_v63 }
 0xce3   :  { %v963_v2 = vmul.f32 %v1313_v62, %v962_v1 }
 0xce5   :  { %v964_v3 = vmul.f32 0.5, %v963_v2 }
 0xce7   :  { %v965_v4 = vsub.f32 1.5, %v964_v3 }
 0xce8   :  { %v1315_v5 = vpop.eup %1314 }
 0xce9   :  { %v966_v6 = vmul.f32 %v1313_v62, %v965_v4  ;;  %v972_v8 = vmul.f32 %v1315_v5, %v960_v63  ;;  %vm978_vm10 = vweird.f32 %v1315_v5 }
 0xcea   :  { %vm979_vm12 = vmor %vm977_vm11, %vm978_vm10 }
 0xceb   :  { %v970_v19 = vsel %vm969_vm9, %v1313_v62, %v966_v6  ;;  %v973_v10 = vmul.f32 %v1315_v5, %v972_v8 }
 0xcec   :  { %v981_v13 = vmul.f32 %v970_v19, %v947_v44 }
 0xced   :  { %v974_v15 = vmul.f32 0.5, %v973_v10 }
 0xcee   :  { %v984_v16 = vmul.f32 %v1260_v9, %v981_v13 }
 0xcef   :  { %v975_v18 = vsub.f32 1.5, %v974_v15 }
 0xcf0   :  { %v987_v20 = vadd.f32 %v1261_v14, %v984_v16 }
 0xcf1   :  { %v976_v21 = vmul.f32 %v1315_v5, %v975_v18 }
 0xcf2   :  { %1206 = vmatmul.msk.f32.vlgmr.msrb.gmra.mxu3 %vm92_vm1, %v987_v20 }
 0xcf3   :  { %v980_v22 = vsel %vm979_vm12, %v1315_v5, %v976_v21 }
 0xcf4   :  { %v982_v24 = vmul.f32 %v980_v22, %v948_v35  ;;  %v1108_v35 = vld [vmem:[#allocation2 + $0x40] sm:$0xff] }
 0xcf5   :  { %1131 = vmatpush.msrb.mxu0 %v1108_v35 }
 0xcf6   :  { %v985_v25 = vmul.f32 %v1260_v9, %v982_v24 }
 0xcf7   :  { %1132 = vmatpush.msrb.mxu0 %v1107_v48 }
 0xcf8   :  { %v988_v26 = vadd.f32 %v1261_v14, %v985_v25 }
 0xcf9   :  { %1133 = vmatpush.msrb.mxu0 %v1106_v49 }
 0xcfa   :  { %1207 = vmatmul.msk.f32.gmra.mxu3 %vm92_vm1, %v988_v26 }
 0xd75   :  { %v1018_v33 = vpop.f32.mrf.mxu3 }
 0xd76   :  { %v1019_v34 = vadd.f32 %v1262_v32, %v1018_v33 }
 0xd78   :  { %v1024_v36 = vmax.f32 %v1019_v34, 0.0 }
 0xd7a   :  { %1208 = vmatmul.msk.f32.vlgmr.msra.gmra.mxu1 %vm549_vm15, %v1024_v36 }
 0xd7d   :  { %v1021_v11 = vpop.f32.mrf.mxu3 }
 0xd7e   :  { %v1022_v23 = vadd.f32 %v1262_v32, %v1021_v11 }
 0xd80   :  { %v1025_v38 = vmax.f32 %v1022_v23, 0.0 }
 0xd82   :  { %1209 = vmatmul.msk.f32.gmra.mxu1 %vm549_vm15, %v1025_v38 }
 0xdf7   :  { %v1058_v7 = vpop.f32.mrf.mxu1 }
 0xdf8   :  { %v1064_v44 = vadd.f32 %v1058_v7, %v1595_v37 }
 0xdfa   :  { %v1067_v45 = vadd.f32 %v1263_v43, %v1064_v44 }
 0xdfc   :  { %1210 = vmatmul.msk.f32.vlgmr.msra.gmra.mxu2 %vm92_vm1, %v1067_v45 }
 0xdff   :  { %v1061_v12 = vpop.f32.mrf.mxu1 }
 0xe00   :  { %v1065_v46 = vadd.f32 %v1061_v12, %v1600_v29  ;;  %v1265_v29 = vld [vmem:[#allocation2 + $0x52] ss:$0 sm:$0xff] }
 0xe02   :  { %v1068_v47 = vadd.f32 %v1263_v43, %v1065_v46 }
 0xe04   :  { %1211 = vmatmul.msk.f32.gmra.mxu2 %vm92_vm1, %v1068_v47 }
 0xe7f   :  { %v1098_v51 = vpop.f32.mrf.mxu2 }
 0xe80   :  { %v1099_v52 = vadd.f32 %v1264_v50, %v1098_v51 }
 0xe82   :  { %v1104_v53 = vmax.f32 %v1099_v52, 0.0 }
 0xe84   :  { %1212 = vmatmul.msk.f32.vlgmr.msrb.gmra.mxu0 %vm92_vm1, %v1104_v53 }
 0xe87   :  { %v1101_v37 = vpop.f32.mrf.mxu2 }
 0xe88   :  { %v1102_v17 = vadd.f32 %v1264_v50, %v1101_v37 }
 0xe8a   :  { %v1105_v54 = vmax.f32 %v1102_v17, 0.0 }
 0xe8c   :  { %1213 = vmatmul.msk.f32.gmra.mxu0 %vm92_vm1, %v1105_v54 }
 0xf01   :  { %v1135_v55 = vpop.f32.mrf.mxu0 }
 0xf02   :  { %v1136_v56 = vadd.f32 %v1265_v29, %v1135_v55 }
 0xf04   :  { %1142 = vst.msk [vmem:[#allocation7] sm:$0xff] %vm1141_vm13, %v1136_v56 }
 0xf09   :  { %v1138_v57 = vpop.f32.mrf.mxu0 }
 0xf0a   :  { %v1139_v58 = vadd.f32 %v1265_v29, %v1138_v57 }
 0xf0c   :  { %1143 = vst.msk [vmem:[#allocation7 + $0x8] sm:$0xff] %vm1141_vm13, %v1139_v58 }
 0xf0d   :  { %1156 = dma.vmem_to_hbm [thread:$0]  %s1149_s11, 256, %s1151_s14, [#allocation4], %s1395_s23, %s1395_s23, %s1396_s24  }
 0xf0e   :  { %1392 = dma.done.wait [#allocation4], 256  }
 0xf0f   :  { %1393 = vsyncadd [#allocation4], 4294967040 }
 0xf10   :  { %1161 = vsyncpa [#allocation3], 1 }
 0xf11   :  { %1162 = vsyncpa [#allocation6], 1 }
 0xf12   :  { %1163 = vsyncpa [#allocation4], 1 }

</bundles_post_ra>
